<compile_context>
chip_gen: v7x
topology: tpu7x:2x2x1
jax: 0.10.0
libtpu: 0.0.40
codegen_flags: <defaults>
</compile_context>

<pallas_src>
import functools

import numpy as np
import jax
import jax.numpy as jnp
from jax.experimental import pallas as pl
from jax.experimental.pallas import tpu as pltpu

K = 7          # spatial conv kernel size
PAD = 3        # "same" padding for k=7, stride=1


# ----------------------------------------------------------------------------
# Kernel: whole batch block per grid step, everything fused.
# ----------------------------------------------------------------------------
def cbam3d_kernel(w1t_ref, b1_ref, w2t_ref, b2_ref, s_cat_ref, x_ref, o_ref):
    """
    w1t_ref  : (F, Fr)   f32   channel-MLP layer-1 weight, transposed (in x out)
    b1_ref   : (1, Fr)   f32   channel-MLP layer-1 bias (row)
    w2t_ref  : (Fr, F)   f32   channel-MLP layer-2 weight, transposed
    b2_ref   : (1, F)    f32   channel-MLP layer-2 bias (row)
    s_cat_ref: (2V, V)   bf16  im2col'd 7x7x7 conv weights, [S_avg; S_min]
    x_ref    : (Bt, F, V)      input block (lane-dense, V = D*W*H)
    o_ref    : (Bt, F, V)      output block
    """
    x = x_ref[...].astype(jnp.float32)                     # (Bt, F, V)
    bt, f_dim, v_dim = x.shape

    # ---- Channel attention --------------------------------------------------
    # Global avg / min pool over the spatial volume (lane-axis reductions).
    avg_c = jnp.sum(x, axis=2) * jnp.float32(1.0 / v_dim)   # (Bt, F)
    min_c = jnp.min(x, axis=2)                              # (Bt, F)

    # Batched two-layer MLP: one pass over the stacked (2*Bt, F) pools.
    pooled = jnp.concatenate([avg_c, min_c], axis=0)        # (2*Bt, F)
    h = jnp.dot(pooled, w1t_ref[...],
                preferred_element_type=jnp.float32) + b1_ref[...]   # (2*Bt, Fr)
    h = jnp.maximum(h, 0.0)                                 # ReLU
    mlp_out = jnp.dot(h, w2t_ref[...],
                      preferred_element_type=jnp.float32) + b2_ref[...]  # (2*Bt, F)

    ca_logit = mlp_out[:bt] + mlp_out[bt:]                  # (Bt, F)
    # Tiny (Bt, F) tensor: exact sigmoid, not perf relevant.
    ca = 1.0 / (1.0 + jnp.exp(-ca_logit))
    x_ca = x * ca[:, :, None]                               # (Bt, F, V)

    # ---- Spatial attention --------------------------------------------------
    # Channel pooling (mean & min over F).
    pa = jnp.sum(x_ca, axis=1) * jnp.float32(1.0 / f_dim)   # (Bt, V)
    pm = jnp.min(x_ca, axis=1)                              # (Bt, V)

    # 3D conv (2->1, k=7, "same", no bias) as ONE MXU matmul: the two pooled
    # channels form a (Bt, 2V) LHS against the concatenated bf16 weight matrix
    # [S_avg; S_min] (2V, V); padding + all 343 taps/channel are folded in.
    lhs = jnp.concatenate([pa, pm], axis=1).astype(jnp.bfloat16)   # (Bt, 2V)
    att_lin = jnp.dot(lhs, s_cat_ref[...],
                      preferred_element_type=jnp.float32)          # (Bt, V)

    # Sigmoid via exp + approximate reciprocal: both land on the EUP slot.
    att = pl.reciprocal(1.0 + jnp.exp(-att_lin), approx=True)      # (Bt, V)

    # Single broadcasted, lane-dense apply + store.
    o_ref[...] = (x_ca * att[:, None, :]).astype(o_ref.dtype)


# ----------------------------------------------------------------------------
# Host-side, one-time (pure NumPy) construction of the im2col'd conv matrix.
# ----------------------------------------------------------------------------
def build_spatial_conv_matrix(conv_weight, d_dim, w_dim, h_dim):
    """conv_weight: (1, 2, K, K, K) OIDHW -> (2V, V) bf16 matrix [S_avg; S_min].

    S_c[dp*W*H + wp*H + hp, d*W*H + w*H + h] =
        weight[c, dp-d+PAD, wp-w+PAD, hp-h+PAD]
    when all three kernel offsets lie in [0, K), else 0 (this also encodes the
    zero "same" padding, so the kernel needs no padded scratch at all).

    Pure static index math on fixed weights; call ONCE per weight, not per
    forward pass.
    """
    v_dim = d_dim * w_dim * h_dim
    if v_dim > 2048:
        # TODO(synk): banded per-(c, kd) (W*H, W*H) shift matrices + D-tiled
        # grid with halo for large volumes; the dense form blows VMEM.
        raise NotImplementedError("dense im2col conv matrix gated to V <= 2048")

    wt = np.asarray(conv_weight, np.float32)[0]             # (2, K, K, K)
    dp = np.arange(d_dim).reshape(d_dim, 1, 1, 1, 1, 1)
    wp = np.arange(w_dim).reshape(1, w_dim, 1, 1, 1, 1)
    hp = np.arange(h_dim).reshape(1, 1, h_dim, 1, 1, 1)
    d = np.arange(d_dim).reshape(1, 1, 1, d_dim, 1, 1)
    w = np.arange(w_dim).reshape(1, 1, 1, 1, w_dim, 1)
    h = np.arange(h_dim).reshape(1, 1, 1, 1, 1, h_dim)
    kd = dp - d + PAD
    kw = wp - w + PAD
    kh = hp - h + PAD
    valid = ((kd >= 0) & (kd < K) & (kw >= 0) & (kw < K) & (kh >= 0) & (kh < K))
    kd_c = np.clip(kd, 0, K - 1)
    kw_c = np.clip(kw, 0, K - 1)
    kh_c = np.clip(kh, 0, K - 1)

    mats = []
    for c in range(2):                                      # 0: avg-pool, 1: min-pool
        s = wt[c][kd_c, kw_c, kh_c]                         # (D, W, H, D, W, H)
        s = np.where(valid, s, np.float32(0.0)).reshape(v_dim, v_dim)
        mats.append(s)
    s_cat = np.concatenate(mats, axis=0)                    # (2V, V)
    # bf16 halves the dominant HBM traffic and feeds the MXU natively.
    return jnp.asarray(s_cat, jnp.bfloat16)


# ----------------------------------------------------------------------------
# Wrapper: lane-dense reshape + pallas_call.
# ----------------------------------------------------------------------------
@functools.partial(jax.jit, static_argnames=("batch_block",))
def cbam3d_forward(x, w1, b1, w2, b2, s_cat, *, batch_block=None):
    """x: (B, F, D, W, H); w1: (Fr, F); b1: (Fr,); w2: (F, Fr); b2: (F,);
    s_cat: precomputed (2V, V) bf16 conv matrix (build_spatial_conv_matrix).

    batch_block=None  -> whole batch in one grid step (best on v5e/v6e).
    batch_block=B//2  -> two grid steps sharded across the v7x TensorCores.
    """
    b_dim, f_dim, d_dim, w_dim, h_dim = x.shape
    v_dim = d_dim * w_dim * h_dim
    fr = w1.shape[0]
    if batch_block is None:
        batch_block = b_dim
    assert b_dim % batch_block == 0
    grid = (b_dim // batch_block,)

    # Wrapper-side layout plumbing: lane-dense (B, F, V) slab, transposed MLP
    # weights so the kernel runs row-major (rows = pooled vectors) matmuls.
    x2 = x.reshape(b_dim, f_dim, v_dim).astype(jnp.float32)
    w1t = jnp.asarray(w1, jnp.float32).T                    # (F, Fr)
    w2t = jnp.asarray(w2, jnp.float32).T                    # (Fr, F)
    b1r = jnp.asarray(b1, jnp.float32).reshape(1, fr)
    b2r = jnp.asarray(b2, jnp.float32).reshape(1, f_dim)

    out2 = pl.pallas_call(
        cbam3d_kernel,
        out_shape=jax.ShapeDtypeStruct((b_dim, f_dim, v_dim), x.dtype),
        grid_spec=pltpu.PrefetchScalarGridSpec(
            num_scalar_prefetch=0,
            grid=grid,
            in_specs=[
                pl.BlockSpec((f_dim, fr), lambda i: (0, 0)),          # W1^T
                pl.BlockSpec((1, fr), lambda i: (0, 0)),              # b1
                pl.BlockSpec((fr, f_dim), lambda i: (0, 0)),          # W2^T
                pl.BlockSpec((1, f_dim), lambda i: (0, 0)),           # b2
                pl.BlockSpec((2 * v_dim, v_dim), lambda i: (0, 0)),   # [S_avg; S_min]
                pl.BlockSpec((batch_block, f_dim, v_dim), lambda i: (i, 0, 0)),
            ],
            out_specs=pl.BlockSpec((batch_block, f_dim, v_dim), lambda i: (i, 0, 0)),
        ),
        compiler_params=pltpu.CompilerParams(
            dimension_semantics=("parallel",),   # batch axis (megacore on v7x)
            vmem_limit_bytes=32 * 1024 * 1024,   # ~2.5 MiB actually used here
        ),
    )(w1t, b1r, w2t, b2r, s_cat, x2)

    return out2.reshape(b_dim, f_dim, d_dim, w_dim, h_dim)


# ----------------------------------------------------------------------------
# Pure-JAX reference mirroring the PyTorch CBAM3D forward.
# ----------------------------------------------------------------------------
def reference(x, w1, b1, w2, b2, conv_weight):
    xf = x.astype(jnp.float32)
    # Channel attention
    avg = jnp.mean(xf, axis=(2, 3, 4))                      # (B, F)
    mn = jnp.min(xf, axis=(2, 3, 4))                        # (B, F)

    def mlp(v):
        h = jax.nn.relu(jnp.dot(v, w1.T, precision=jax.lax.Precision.HIGHEST) + b1)
        return jnp.dot(h, w2.T, precision=jax.lax.Precision.HIGHEST) + b2

    ca = jax.nn.sigmoid(mlp(avg) + mlp(mn))                 # (B, F)
    x1 = xf * ca[:, :, None, None, None]

    # Spatial attention
    pa = jnp.mean(x1, axis=1, keepdims=True)
    pm = jnp.min(x1, axis=1, keepdims=True)
    cat = jnp.concatenate([pa, pm], axis=1)                 # (B, 2, D, W, H)
    conv = jax.lax.conv_general_dilated(
        cat, conv_weight.astype(jnp.float32),
        window_strides=(1, 1, 1), padding=[(PAD, PAD)] * 3,
        dimension_numbers=("NCDHW", "OIDHW", "NCDHW"),
        precision=jax.lax.Precision.HIGHEST)
    att = jax.nn.sigmoid(conv)                              # (B, 1, D, W, H)
    return (x1 * att).astype(x.dtype)


if __name__ == "__main__":
    key = jax.random.PRNGKey(0)
    kx, kcw, k1, k2, k3, k4 = jax.random.split(key, 6)

    # Small shapes consistent with the module: channels=32, reduction=16 -> hidden=2.
    B, F_, D_, W_, H_ = 2, 32, 8, 8, 8
    REDUCTION = 16
    FR = F_ // REDUCTION

    x = jax.random.normal(kx, (B, F_, D_, W_, H_), dtype=jnp.float32)
    conv_weight = jax.random.normal(kcw, (1, 2, K, K, K), dtype=jnp.float32) * 0.05
    w1 = jax.random.normal(k1, (FR, F_), dtype=jnp.float32) * 0.2
    b1 = jax.random.normal(k2, (FR,), dtype=jnp.float32) * 0.1
    w2 = jax.random.normal(k3, (F_, FR), dtype=jnp.float32) * 0.2
    b2 = jax.random.normal(k4, (F_,), dtype=jnp.float32) * 0.1

    # One-time host-side (NumPy) build of the conv matrix, outside the hot path.
    s_cat = build_spatial_conv_matrix(np.asarray(conv_weight), D_, W_, H_)

    out = jax.block_until_ready(cbam3d_forward(x, w1, b1, w2, b2, s_cat))
    ref = jax.block_until_ready(reference(x, w1, b1, w2, b2, conv_weight))

    # Tolerance deliberately loosened vs. the f32 reference: the spatial-conv
    # weights (and its LHS) are bf16 on the MXU, plus the approximate EUP
    # reciprocal in the spatial sigmoid.
    np.testing.assert_allclose(np.asarray(out), np.asarray(ref), rtol=1e-2, atol=1e-2)

    print("KERNEL_OK")
</pallas_src>

<mosaic_0001>
module attributes {stable_mosaic.version = 11 : i64} {
  func.func @cbam3d_kernel(%arg0: i32, %arg1: memref<32x2xf32, #tpu.memory_space<vmem>>, %arg2: memref<1x2xf32, #tpu.memory_space<vmem>>, %arg3: memref<2x32xf32, #tpu.memory_space<vmem>>, %arg4: memref<1x32xf32, #tpu.memory_space<vmem>>, %arg5: memref<1024x512xbf16, #tpu.memory_space<vmem>>, %arg6: memref<2x32x512xf32, #tpu.memory_space<vmem>>, %arg7: memref<2x32x512xf32, #tpu.memory_space<vmem>>) attributes {dimension_semantics = [#tpu.dimension_semantics<parallel>], iteration_bounds = array<i64: 1>, scalar_prefetch = 0 : i64, scratch_operands = 0 : i64, tpu.core_type = #tpu.core_type<tc>, window_params = [{pipeline_mode = #tpu.pipeline_mode<synchronous>, transform_indices = @transform_0, window_bounds = array<i64: 32, 2>}, {pipeline_mode = #tpu.pipeline_mode<synchronous>, transform_indices = @transform_1, window_bounds = array<i64: 1, 2>}, {pipeline_mode = #tpu.pipeline_mode<synchronous>, transform_indices = @transform_2, window_bounds = array<i64: 2, 32>}, {pipeline_mode = #tpu.pipeline_mode<synchronous>, transform_indices = @transform_3, window_bounds = array<i64: 1, 32>}, {pipeline_mode = #tpu.pipeline_mode<synchronous>, transform_indices = @transform_4, window_bounds = array<i64: 1024, 512>}, {transform_indices = @transform_5, window_bounds = array<i64: 2, 32, 512>}, {transform_indices = @transform_6, window_bounds = array<i64: 2, 32, 512>}]} {
    %c0 = arith.constant 0 : index
    %c0_0 = arith.constant 0 : index
    %c0_1 = arith.constant 0 : index
    %0 = vector.load %arg6[%c0, %c0_0, %c0_1] : memref<2x32x512xf32, #tpu.memory_space<vmem>>, vector<2x32x512xf32>
    %cst = arith.constant dense<0.000000e+00> : vector<2x32xf32>
    %1 = vector.multi_reduction <add>, %0, %cst [2] : vector<2x32x512xf32> to vector<2x32xf32>
    %cst_2 = arith.constant 0.001953125 : f32
    %2 = vector.broadcast %cst_2 : f32 to vector<2x32xf32>
    %3 = arith.mulf %1, %2 : vector<2x32xf32>
    %cst_3 = arith.constant dense<0x7F800000> : vector<2x32xf32>
    %4 = vector.multi_reduction <minimumf>, %0, %cst_3 [2] : vector<2x32x512xf32> to vector<2x32xf32>
    %5 = tpu.concatenate %3, %4 in 0 : vector<2x32xf32>, vector<2x32xf32> -> vector<4x32xf32>
    %c0_4 = arith.constant 0 : index
    %c0_5 = arith.constant 0 : index
    %6 = vector.load %arg1[%c0_4, %c0_5] : memref<32x2xf32, #tpu.memory_space<vmem>>, vector<32x2xf32>
    %cst_6 = arith.constant dense<0.000000e+00> : vector<4x2xf32>
    %7 = tpu.matmul %5, %6, %cst_6 {dimension_numbers = #tpu.dot_dimension_numbers<[1], [0], [0], [1], [0, 0, 1, 1], [], []>} : vector<4x32xf32>, vector<32x2xf32>, vector<4x2xf32> -> vector<4x2xf32>
    %c0_7 = arith.constant 0 : index
    %c0_8 = arith.constant 0 : index
    %8 = vector.load %arg2[%c0_7, %c0_8] : memref<1x2xf32, #tpu.memory_space<vmem>>, vector<1x2xf32>
    %9 = vector.broadcast %8 : vector<1x2xf32> to vector<4x2xf32>
    %10 = arith.addf %7, %9 : vector<4x2xf32>
    %cst_9 = arith.constant 0.000000e+00 : f32
    %11 = vector.broadcast %cst_9 : f32 to vector<4x2xf32>
    %12 = arith.maximumf %10, %11 : vector<4x2xf32>
    %c0_10 = arith.constant 0 : index
    %c0_11 = arith.constant 0 : index
    %13 = vector.load %arg3[%c0_10, %c0_11] : memref<2x32xf32, #tpu.memory_space<vmem>>, vector<2x32xf32>
    %cst_12 = arith.constant dense<0.000000e+00> : vector<4x32xf32>
    %14 = tpu.matmul %12, %13, %cst_12 {dimension_numbers = #tpu.dot_dimension_numbers<[1], [0], [0], [1], [0, 0, 1, 1], [], []>} : vector<4x2xf32>, vector<2x32xf32>, vector<4x32xf32> -> vector<4x32xf32>
    %c0_13 = arith.constant 0 : index
    %c0_14 = arith.constant 0 : index
    %15 = vector.load %arg4[%c0_13, %c0_14] : memref<1x32xf32, #tpu.memory_space<vmem>>, vector<1x32xf32>
    %16 = vector.broadcast %15 : vector<1x32xf32> to vector<4x32xf32>
    %17 = arith.addf %14, %16 : vector<4x32xf32>
    %18 = vector.extract_strided_slice %17 {offsets = [0, 0], sizes = [2, 32], strides = [1, 1]} : vector<4x32xf32> to vector<2x32xf32>
    %19 = vector.extract_strided_slice %17 {offsets = [2, 0], sizes = [2, 32], strides = [1, 1]} : vector<4x32xf32> to vector<2x32xf32>
    %20 = arith.addf %18, %19 : vector<2x32xf32>
    %cst_15 = arith.constant 0.000000e+00 : f32
    %21 = vector.broadcast %cst_15 : f32 to vector<2x32xf32>
    %22 = arith.subf %21, %20 : vector<2x32xf32>
    %23 = math.exp %22 : vector<2x32xf32>
    %cst_16 = arith.constant 1.000000e+00 : f32
    %24 = vector.broadcast %cst_16 : f32 to vector<2x32xf32>
    %25 = arith.addf %24, %23 : vector<2x32xf32>
    %cst_17 = arith.constant 1.000000e+00 : f32
    %26 = vector.broadcast %cst_17 : f32 to vector<2x32xf32>
    %27 = arith.divf %26, %25 : vector<2x32xf32>
    %28 = vector.shape_cast %27 : vector<2x32xf32> to vector<2x32x1xf32>
    %29 = vector.broadcast %28 : vector<2x32x1xf32> to vector<2x32x512xf32>
    %30 = arith.mulf %0, %29 : vector<2x32x512xf32>
    %cst_18 = arith.constant dense<0.000000e+00> : vector<2x512xf32>
    %31 = vector.multi_reduction <add>, %30, %cst_18 [1] : vector<2x32x512xf32> to vector<2x512xf32>
    %cst_19 = arith.constant 3.125000e-02 : f32
    %32 = vector.broadcast %cst_19 : f32 to vector<2x512xf32>
    %33 = arith.mulf %31, %32 : vector<2x512xf32>
    %cst_20 = arith.constant dense<0x7F800000> : vector<2x512xf32>
    %34 = vector.multi_reduction <minimumf>, %30, %cst_20 [1] : vector<2x32x512xf32> to vector<2x512xf32>
    %35 = tpu.concatenate %33, %34 in 1 : vector<2x512xf32>, vector<2x512xf32> -> vector<2x1024xf32>
    %36 = arith.truncf %35 : vector<2x1024xf32> to vector<2x1024xbf16>
    %c0_21 = arith.constant 0 : index
    %c0_22 = arith.constant 0 : index
    %37 = vector.load %arg5[%c0_21, %c0_22] : memref<1024x512xbf16, #tpu.memory_space<vmem>>, vector<1024x512xbf16>
    %cst_23 = arith.constant dense<0.000000e+00> : vector<2x512xf32>
    %38 = tpu.matmul %36, %37, %cst_23 {dimension_numbers = #tpu.dot_dimension_numbers<[1], [0], [0], [1], [0, 0, 1, 1], [], []>} : vector<2x1024xbf16>, vector<1024x512xbf16>, vector<2x512xf32> -> vector<2x512xf32>
    %cst_24 = arith.constant 0.000000e+00 : f32
    %39 = vector.broadcast %cst_24 : f32 to vector<2x512xf32>
    %40 = arith.subf %39, %38 : vector<2x512xf32>
    %41 = math.exp %40 : vector<2x512xf32>
    %cst_25 = arith.constant 1.000000e+00 : f32
    %42 = vector.broadcast %cst_25 : f32 to vector<2x512xf32>
    %43 = arith.addf %42, %41 : vector<2x512xf32>
    %44 = tpu.reciprocal %43 {approx = true} : vector<2x512xf32> -> vector<2x512xf32>
    %45 = vector.shape_cast %44 : vector<2x512xf32> to vector<2x1x512xf32>
    %46 = vector.broadcast %45 : vector<2x1x512xf32> to vector<2x32x512xf32>
    %47 = arith.mulf %30, %46 : vector<2x32x512xf32>
    %c0_26 = arith.constant 0 : index
    %c0_27 = arith.constant 0 : index
    %c0_28 = arith.constant 0 : index
    %48 = vector.load %arg7[%c0_26, %c0_27, %c0_28] : memref<2x32x512xf32, #tpu.memory_space<vmem>>, vector<2x32x512xf32>
    tpu.vector_store %arg7[%c0_26, %c0_27, %c0_28], %47 {strides = array<i32>} : memref<2x32x512xf32, #tpu.memory_space<vmem>>, vector<2x32x512xf32>,
    return
  }
  func.func @transform_0(%arg0: i32) -> (i32, i32) {
    %c0_i32 = arith.constant 0 : i32
    %c0_i32_0 = arith.constant 0 : i32
    %c0_i32_1 = arith.constant 0 : i32
    return %c0_i32, %c0_i32_0 : i32, i32
  }
  func.func @transform_1(%arg0: i32) -> (i32, i32) {
    %c0_i32 = arith.constant 0 : i32
    %c0_i32_0 = arith.constant 0 : i32
    %c0_i32_1 = arith.constant 0 : i32
    return %c0_i32, %c0_i32_0 : i32, i32
  }
  func.func @transform_2(%arg0: i32) -> (i32, i32) {
    %c0_i32 = arith.constant 0 : i32
    %c0_i32_0 = arith.constant 0 : i32
    %c0_i32_1 = arith.constant 0 : i32
    return %c0_i32, %c0_i32_0 : i32, i32
  }
  func.func @transform_3(%arg0: i32) -> (i32, i32) {
    %c0_i32 = arith.constant 0 : i32
    %c0_i32_0 = arith.constant 0 : i32
    %c0_i32_1 = arith.constant 0 : i32
    return %c0_i32, %c0_i32_0 : i32, i32
  }
  func.func @transform_4(%arg0: i32) -> (i32, i32) {
    %c0_i32 = arith.constant 0 : i32
    %c0_i32_0 = arith.constant 0 : i32
    %c0_i32_1 = arith.constant 0 : i32
    return %c0_i32, %c0_i32_0 : i32, i32
  }
  func.func @transform_5(%arg0: i32) -> (i32, i32, i32) {
    %c0_i32 = arith.constant 0 : i32
    %c0_i32_0 = arith.constant 0 : i32
    %c0_i32_1 = arith.constant 0 : i32
    return %arg0, %c0_i32, %c0_i32_0 : i32, i32, i32
  }
  func.func @transform_6(%arg0: i32) -> (i32, i32, i32) {
    %c0_i32 = arith.constant 0 : i32
    %c0_i32_0 = arith.constant 0 : i32
    %c0_i32_1 = arith.constant 0 : i32
    return %arg0, %c0_i32, %c0_i32_0 : i32, i32, i32
  }
}

</mosaic_0001>

<bundles_post_ra>
// kernel: cbam3d_forward.1
= control target key start
LH: loop header
LB: loop body
LE: loop exit
PB: predicated region body
PF: predicated region fallthrough
CT: control target
= control target key end

     0   :  { %11 = vsyncpa [#allocation3], 0  ;;  %s3518_s21 = smov [#allocation2]   ;;  %s4160_s0 = inlined_call_operand.vmem [shape: f32[32,2], index: 0, kind: input, shape index: {}]   ;;  %s4161_s1 = inlined_call_operand.vmem [shape: f32[1,2], index: 1, kind: input, shape index: {}]   ;;  %s4162_s2 = inlined_call_operand.vmem [shape: f32[2,32], index: 2, kind: input, shape index: {}]   ;;  %s4163_s3 = inlined_call_operand.vmem [shape: f32[1,32], index: 3, kind: input, shape index: {}]   ;;  %s4164_s4 = inlined_call_operand.hbm [shape: bf16[1024,512], index: 4, kind: input, shape index: {}]   ;;  %s4165_s5 = inlined_call_operand.vmem [shape: f32[2,32,512], index: 5, kind: input, shape index: {}]   ;;  %s4166_s6 = inlined_call_operand.vmem [shape: f32[2,32,512], index: 6, kind: output, shape index: {}]  }
   0x1   :  { %s25_s22 = sshll.u32 %s3518_s21, 4  ;;  %s3494_s25 = scalar_lea.hbm %s4164_s4, 32768  ;;  %s26_s22 = int_to_ptr.vmem [resolvable:$true] %s25_s22 }
   0x2   :  { %p3495_p0 = scmp.ne.s32.totalorder %s4164_s4, %s3494_s25  ;;  %p3498_p1 = scmp.lt.u32.totalorder %s3494_s25, %s4164_s4 }
   0x4   :  { %p3500_p2 = pnand %p3498_p1, %p3495_p0 }
   0x6   :  { %3503 = shalt.err (!%p3500_p2)
}
   0x7   :  { %s3504_s30 = scalar_lea.vmem %s26_s22, 32768  ;;  %p3509_p4 = scmp.lt.s32.totalorder %s26_s22, %s26_s22 }
   0x8   :  { %p3505_p3 = scmp.ne.s32.totalorder %s26_s22, %s3504_s30  ;;  %p3510_p5 = scmp.lt.s32.totalorder %s3504_s30, %s3504_s30 }
   0xa   :  { %p3511_p6 = por %p3510_p5, %p3509_p4 }
   0xc   :  { %p3512_p7 = pnand %p3511_p6, %p3505_p3 }
   0xe   :  { %3515 = shalt.err (!%p3512_p7)
}
   0xf   :  { %s3519_s7 = smov 256   ;;  %s3520_s8 = smov 16  }
  0x10   :  { %31 = dma.hbm_to_vmem [thread:$0]  %s4164_s4, 32768, %s26_s22, [#allocation3], %s3519_s7, %s3519_s7, %s3520_s8  }
  0x11   :  { %3516 = dma.done.wait [#allocation3], 32768  }
  0x12   :  { %3517 = vsyncadd [#allocation3], 4294934528  ;;  %v3575_v0 = vld [vmem:[%s4165_s5 + $0x80] sm:$0xff]  ;;  %v3580_v1 = vld [vmem:[%s4165_s5 + $0x88] sm:$0xff]  ;;  %vm3522_vm0 = vmmov 0   ;;  %vm176_vm1 = vcmask 130112  }
  0x13   :  { %v3585_v2 = vld [vmem:[%s4165_s5 + $0x90] sm:$0xff]  ;;  %v89_v3 = vadd.f32 %v3580_v1, %v3575_v0  ;;  %v3592_v4 = vld [vmem:[%s4165_s5] sm:$0xff]  ;;  %v38_v5 = vld [vmem:[%s4165_s5 + $0x8] sm:$0xff]  ;;  %v137_v61 = vmin.f32 %v3575_v0, %v3580_v1  ;;  %vm183_vm2 = vcmask 195712   ;;  %vm190_vm3 = vcmask 261312  }
  0x14   :  { %v3600_v6 = vld [vmem:[%s4165_s5 + $0x98] sm:$0xff]  ;;  %v39_v7 = vld [vmem:[%s4165_s5 + $0x10] sm:$0xff]  ;;  %v69_v8 = vadd.f32 %v38_v5, %v3592_v4  ;;  %v57_v9 = vld [vmem:[%s4165_s5 + $0xa0] sm:$0xff]  ;;  %v117_v55 = vmin.f32 %v3592_v4, %v38_v5  ;;  %vm211_vm4 = vcmask 1041409   ;;  %vm260_vm5 = vcmask 1043459  }
  0x15   :  { %v90_v10 = vadd.f32 %v89_v3, %v3585_v2  ;;  %v3613_v11 = vld [vmem:[%s4165_s5 + $0x18] sm:$0xff]  ;;  %v58_v12 = vld [vmem:[%s4165_s5 + $0xa8] sm:$0xff]  ;;  %v59_v13 = vld [vmem:[%s4165_s5 + $0xb0] sm:$0xff]  ;;  %vm263_vm6 = vcmask 1041408   ;;  %vm276_vm7 = vcmask 261120   ;;  %vm359_vm8 = vcmask 15360  }
  0x16   :  { %v70_v14 = vadd.f32 %v69_v8, %v39_v7  ;;  %v94_v15 = vadd.f32 %v58_v12, %v57_v9  ;;  %v41_v16 = vld [vmem:[%s4165_s5 + $0x20] sm:$0xff]  ;;  %v42_v17 = vld [vmem:[%s4165_s5 + $0x28] sm:$0xff]  ;;  %v43_v18 = vld [vmem:[%s4165_s5 + $0x30] sm:$0xff]  ;;  %v142_v58 = vmin.f32 %v57_v9, %v58_v12  ;;  %v118_v60 = vmin.f32 %v117_v55, %v39_v7 }
  0x17   :  { %v91_v19 = vadd.f32 %v90_v10, %v3600_v6  ;;  %v3634_v20 = vld [vmem:[%s4165_s5 + $0xb8] sm:$0xff]  ;;  %v74_v21 = vadd.f32 %v42_v17, %v41_v16  ;;  %v61_v22 = vld [vmem:[%s4165_s5 + $0xc0] sm:$0xff]  ;;  %v62_v23 = vld [vmem:[%s4165_s5 + $0xc8] sm:$0xff]  ;;  %v122_v52 = vmin.f32 %v41_v16, %v42_v17  ;;  %v138_v10 = vmin.f32 %v137_v61, %v3585_v2 }
  0x18   :  { %v71_v24 = vadd.f32 %v70_v14, %v3613_v11  ;;  %v95_v25 = vadd.f32 %v94_v15, %v59_v13  ;;  %v44_v26 = vld [vmem:[%s4165_s5 + $0x38] sm:$0xff]  ;;  %v63_v27 = vld [vmem:[%s4165_s5 + $0xd0] sm:$0xff]  ;;  %v99_v28 = vadd.f32 %v62_v23, %v61_v22  ;;  %v45_v29 = vld [vmem:[%s4165_s5 + $0x40] sm:$0xff]  ;;  %v143_v63 = vmin.f32 %v142_v58, %v59_v13 }
  0x19   :  { %92 = vadd.xlane.f32.xlu1 %v91_v19  ;;  %v75_v30 = vadd.f32 %v74_v21, %v43_v18  ;;  %v64_v31 = vld [vmem:[%s4165_s5 + $0xd8] sm:$0xff]  ;;  %v46_v32 = vld [vmem:[%s4165_s5 + $0x48] sm:$0xff]  ;;  %v47_v33 = vld [vmem:[%s4165_s5 + $0x50] sm:$0xff]  ;;  %v123_v57 = vmin.f32 %v122_v52, %v43_v18  ;;  %v147_v3 = vmin.f32 %v61_v22, %v62_v23  ;;  %v119_v8 = vmin.f32 %v118_v60, %v3613_v11 }
  0x1a   :  { %72 = vadd.xlane.f32.xlu0 %v71_v24  ;;  %v96_v34 = vadd.f32 %v95_v25, %v3634_v20  ;;  %v100_v35 = vadd.f32 %v99_v28, %v63_v27  ;;  %v79_v36 = vadd.f32 %v46_v32, %v45_v29  ;;  %v65_v37 = vld [vmem:[%s4165_s5 + $0xe0] sm:$0xff]  ;;  %v66_v38 = vld [vmem:[%s4165_s5 + $0xe8] sm:$0xff]  ;;  %v67_v39 = vld [vmem:[%s4165_s5 + $0xf0] sm:$0xff]  ;;  %v127_v4 = vmin.f32 %v45_v29, %v46_v32 }
  0x1b   :  { %v76_v40 = vadd.f32 %v75_v30, %v44_v26  ;;  %v48_v41 = vld [vmem:[%s4165_s5 + $0x58] sm:$0xff]  ;;  %v104_v42 = vadd.f32 %v66_v38, %v65_v37  ;;  %v49_v43 = vld [vmem:[%s4165_s5 + $0x60] sm:$0xff]  ;;  %v50_v44 = vld [vmem:[%s4165_s5 + $0x68] sm:$0xff]  ;;  %v124_v62 = vmin.f32 %v123_v57, %v44_v26  ;;  %v144_v5 = vmin.f32 %v143_v63, %v3634_v20 }
  0x1c   :  { %v80_v45 = vadd.f32 %v79_v36, %v47_v33  ;;  %v68_v46 = vld [vmem:[%s4165_s5 + $0xf8] sm:$0xff]  ;;  %v51_v47 = vld [vmem:[%s4165_s5 + $0x70] sm:$0xff]  ;;  %v84_v48 = vadd.f32 %v50_v44, %v49_v43  ;;  %v101_v49 = vadd.f32 %v100_v35, %v64_v31  ;;  %v148_v9 = vmin.f32 %v147_v3, %v63_v27  ;;  %v265_v17 = vld [vmem:[%s4160_s0] sm:$0xff] }
  0x1d   :  { %97 = vadd.xlane.f32.xlu1 %v96_v34  ;;  %v105_v50 = vadd.f32 %v104_v42, %v67_v39  ;;  %v52_v51 = vld [vmem:[%s4165_s5 + $0x78] sm:$0xff]  ;;  %v152_v12 = vmin.f32 %v65_v37, %v66_v38  ;;  %v139_v7 = vmin.f32 %v138_v10, %v3600_v6  ;;  %v128_v14 = vmin.f32 %v127_v4, %v47_v33  ;;  %v266_v6 = vld [vmem:[%s4160_s0 + $0x8] sm:$0xff]  ;;  %v267_v20 = vld [vmem:[%s4160_s0 + $0x10] sm:$0xff] }
  0x1e   :  { %77 = vadd.xlane.f32.xlu0 %v76_v40  ;;  %v81_v53 = vadd.f32 %v80_v45, %v48_v41  ;;  %v85_v54 = vadd.f32 %v84_v48, %v51_v47  ;;  %v132_v0 = vmin.f32 %v49_v43, %v50_v44  ;;  %v149_v1 = vmin.f32 %v148_v9, %v64_v31  ;;  %v268_v21 = vld [vmem:[%s4160_s0 + $0x18] sm:$0xff] }
  0x1f   :  { %v106_v56 = vadd.f32 %v105_v50, %v68_v46  ;;  %v153_v13 = vmin.f32 %v152_v12, %v67_v39  ;;  %v129_v15 = vmin.f32 %v128_v14, %v48_v41  ;;  %v3022_v18 = vpack.c.bf16 %v266_v6, %v265_v17 }
  0x20   :  { %v86_v59 = vadd.f32 %v85_v54, %v52_v51  ;;  %v133_v16 = vmin.f32 %v132_v0, %v51_v47  ;;  %v3521_v19 = vmov 0.0|0.0   ;;  %v3025_v22 = vpack.c.bf16 %v268_v21, %v267_v20 }
  0x21   :  { %102 = vadd.xlane.f32.xlu1 %v101_v49  ;;  %v154_v11 = vmin.f32 %v153_v13, %v68_v46  ;;  %3021 = vmatprep.subr.bf16.mxu0 %v3521_v19  ;;  %v3523_v23 = vmov 0.0   ;;  %v165_v29 = vlaneseq }
  0x22   :  { %82 = vadd.xlane.f32.xlu0 %v81_v53  ;;  %v134_v2 = vmin.f32 %v133_v16, %v52_v51  ;;  %3023 = vmatpush3.bf16.msra.mxu0 %v3022_v18 }
  0x23   :  { %3024 = vmatprep.subr.bf16.mxu0 %v3521_v19  ;;  %3013 = vmatprep.mubr.msk.f32.mxu0 %vm3522_vm0, %v3523_v23  ;;  %v166_v32 = vand.u32 127, %v165_v29  ;;  %v3708_v34 = vshrl.u32 %v165_v29, 7 }
  0x24   :  { %3016 = vmatprep.subr.mxu1 %v3523_v23  ;;  %3018 = vmatprep.mubr.msk.f32.mxu1 %vm3522_vm0, %v3523_v23 }
  0x25   :  { %107 = vadd.xlane.f32.xlu1 %v106_v56  ;;  %v171_v35 = vadd.s32 4294967288, %v166_v32  ;;  %v178_v36 = vadd.s32 4294967280, %v166_v32  ;;  %v185_v38 = vadd.s32 4294967272, %v166_v32  ;;  %v169_v40 = vsub.s32 %v166_v32, %v3708_v34  ;;  %v3060_v32 = vld [vmem:[#allocation2 + $0x4] ss:$16 sps:$4 sm:$0xff]  }
  0x26   :  { %87 = vadd.xlane.f32.xlu0 %v86_v59  ;;  %3026 = vmatpush3.bf16.msra.mxu0 %v3025_v22 }
  0x27   :  { %v174_v41 = vsub.s32 %v171_v35, %v3708_v34  ;;  %v181_v43 = vsub.s32 %v178_v36, %v3708_v34  ;;  %v188_v50 = vsub.s32 %v185_v38, %v3708_v34  ;;  %v3063_v35 = vld [vmem:[#allocation2 + $0xc] ss:$16 sps:$4 sm:$0xff]   ;;  %v3066_v36 = vld [vmem:[#allocation2 + $0x24] ss:$16 sps:$4 sm:$0xff]   ;;  %v3064_v38 = vld [vmem:[#allocation2 + $0x20] ss:$16 sps:$4 sm:$0xff]  }
  0x28   :  { %2408 = vmatprep.subr.bf16.mxu0 %v3063_v35  ;;  %v3133_v35 = vld [vmem:[#allocation2 + $0x188] ss:$16 sps:$4 sm:$0xff]  }
  0x29   :  { %125 = vmin.xlane.f32.xlu1 %v124_v62 }
  0x2a   :  { %120 = vmin.xlane.f32.xlu0 %v119_v8 }
  0x2d   :  { %145 = vmin.xlane.f32.xlu1 %v144_v5 }
  0x2e   :  { %140 = vmin.xlane.f32.xlu0 %v139_v7 }
  0x31   :  { %150 = vmin.xlane.f32.xlu1 %v149_v1 }
  0x32   :  { %130 = vmin.xlane.f32.xlu0 %v129_v15 }
  0x35   :  { %155 = vmin.xlane.f32.xlu1 %v154_v11 }
  0x36   :  { %135 = vmin.xlane.f32.xlu0 %v134_v2 }
  0xa6   :  { %v93_v24 = vpop.xlane.xlu1 %92 }
  0xa7   :  { %v73_v25 = vpop.xlane.xlu0 %72  ;;  %v113_v44 = vmul.f32 0.001953125, %v93_v24 }
  0xa8   :  { %v109_v45 = vmul.f32 0.001953125, %v73_v25  ;;  %v351_v25 = vld [vmem:[%s4162_s2] sm:$0x3] }
  0xa9   :  { %v195_v55 = vrot.slane %v113_v44, %v169_v40  ;;  %3017 = vmatpush3.msk.msra.mxu1 %vm263_vm6, %v351_v25  ;;  %v3078_v44 = vld [vmem:[#allocation2 + $0x64] ss:$16 sps:$4 sm:$0xff]   ;;  %v3118_v25 = vld [vmem:[#allocation2 + $0x140] ss:$16 sps:$4 sm:$0xff]  }
  0xaa   :  { %v98_v26 = vpop.xlane.xlu1 %97  ;;  %v170_v56 = vrot.slane %v109_v45, %v169_v40  ;;  %2244 = vmatprep.subr.bf16.mxu1 %v3060_v32  ;;  %v3081_v45 = vld [vmem:[#allocation2 + $0x6c] ss:$16 sps:$4 sm:$0xff]  }
  0xab   :  { %v78_v27 = vpop.xlane.xlu0 %77  ;;  %v114_v42 = vmul.f32 0.001953125, %v98_v26  ;;  %v2737_v26 = vld [vmem:[%s4161_s1] ss:$0 sm:$0xff]  ;;  %v3135_v32 = vld [vmem:[#allocation2 + $0x18c] ss:$16 sps:$4 sm:$0xff]  }
  0xac   :  { %v110_v46 = vmul.f32 0.001953125, %v78_v27 }
  0xad   :  { %v199_v54 = vrot.slane %v114_v42, %v174_v41  ;;  %v3070_v42 = vld [vmem:[#allocation2 + $0x40] ss:$16 sps:$4 sm:$0xff]  }
  0xae   :  { %v103_v28 = vpop.xlane.xlu1 %102  ;;  %v175_v57 = vrot.slane %v110_v46, %v174_v41  ;;  %v3076_v46 = vld [vmem:[#allocation2 + $0x60] ss:$16 sps:$4 sm:$0xff]  }
  0xaf   :  { %v83_v30 = vpop.xlane.xlu0 %82  ;;  %v115_v47 = vmul.f32 0.001953125, %v103_v28  ;;  %v200_v9 = vsel %vm176_vm1, %v199_v54, %v195_v55  ;;  %v3088_v54 = vld [vmem:[#allocation2 + $0xa0] ss:$16 sps:$4 sm:$0xff]   ;;  %v3091_v55 = vld [vmem:[#allocation2 + $0xa8] ss:$16 sps:$4 sm:$0xff]  }
  0xb0   :  { %v111_v49 = vmul.f32 0.001953125, %v83_v30  ;;  %v177_v7 = vsel %vm176_vm1, %v175_v57, %v170_v56  ;;  %v3096_v56 = vld [vmem:[#allocation2 + $0xc4] ss:$16 sps:$4 sm:$0xff]   ;;  %v3099_v57 = vld [vmem:[#allocation2 + $0xcc] ss:$16 sps:$4 sm:$0xff]  }
  0xb1   :  { %v204_v58 = vrot.slane %v115_v47, %v181_v43  ;;  %v3079_v47 = vld [vmem:[#allocation2 + $0x68] ss:$16 sps:$4 sm:$0xff]  }
  0xb2   :  { %v108_v31 = vpop.xlane.xlu1 %107  ;;  %v182_v60 = vrot.slane %v111_v49, %v181_v43  ;;  %v3087_v49 = vld [vmem:[#allocation2 + $0x8c] ss:$16 sps:$4 sm:$0xff]  }
  0xb3   :  { %v88_v33 = vpop.xlane.xlu0 %87  ;;  %v116_v51 = vmul.f32 0.001953125, %v108_v31  ;;  %v205_v14 = vsel %vm183_vm2, %v204_v58, %v200_v9  ;;  %v3058_v31 = vld [vmem:[#allocation2] ss:$16 sps:$4 sm:$0xff]  }
  0xb4   :  { %v112_v53 = vmul.f32 0.001953125, %v88_v33  ;;  %v184_v1 = vsel %vm183_vm2, %v182_v60, %v177_v7  ;;  %v3061_v33 = vld [vmem:[#allocation2 + $0x8] ss:$16 sps:$4 sm:$0xff]   ;;  %v3094_v58 = vld [vmem:[#allocation2 + $0xc0] ss:$16 sps:$4 sm:$0xff]  }
  0xb5   :  { %v209_v61 = vrot.slane %v116_v51, %v188_v50  ;;  %v3085_v51 = vld [vmem:[#allocation2 + $0x88] ss:$16 sps:$4 sm:$0xff]   ;;  %v2739_v60 = vld [vmem:[%s4163_s3] ss:$0 sm:$0xff]  ;;  %v3105_v7 = vld [vmem:[#allocation2 + $0xec] ss:$16 sps:$4 sm:$0xff]  }
  0xb6   :  { %v126_v37 = vpop.xlane.xlu1 %125  ;;  %v189_v8 = vrot.slane %v112_v53, %v188_v50  ;;  %v3093_v53 = vld [vmem:[#allocation2 + $0xac] ss:$16 sps:$4 sm:$0xff]  }
  0xb7   :  { %v121_v39 = vpop.xlane.xlu0 %120  ;;  %v229_v10 = vrot.slane %v126_v37, %v174_v41  ;;  %v210_v13 = vsel %vm190_vm3, %v209_v61, %v205_v14  ;;  %v3069_v37 = vld [vmem:[#allocation2 + $0x2c] ss:$16 sps:$4 sm:$0xff]   ;;  %v3100_v14 = vld [vmem:[#allocation2 + $0xe0] ss:$16 sps:$4 sm:$0xff]  }
  0xb8   :  { %v225_v4 = vrot.slane %v121_v39, %v169_v40  ;;  %v191_v2 = vsel %vm190_vm3, %v189_v8, %v184_v1  ;;  %v3067_v39 = vld [vmem:[#allocation2 + $0x28] ss:$16 sps:$4 sm:$0xff]   ;;  %v3108_v1 = vld [vmem:[#allocation2 + $0x104] ss:$16 sps:$4 sm:$0xff]  }
  0xb9   :  { %v212_v22 = vsel %vm211_vm4, %v210_v13, %v191_v2  ;;  %v3111_v13 = vld [vmem:[#allocation2 + $0x10c] ss:$16 sps:$4 sm:$0xff]  }
  0xba   :  { %v146_v48 = vpop.xlane.xlu1 %145  ;;  %v230_v17 = vsel %vm176_vm1, %v229_v10, %v225_v4 }
  0xbb   :  { %v141_v52 = vpop.xlane.xlu0 %140  ;;  %v248_v62 = vrot.slane %v146_v48, %v174_v41  ;;  %v3075_v41 = vld [vmem:[#allocation2 + $0x4c] ss:$16 sps:$4 sm:$0xff]   ;;  %v3084_v48 = vld [vmem:[#allocation2 + $0x84] ss:$16 sps:$4 sm:$0xff]  }
  0xbc   :  { %v244_v63 = vrot.slane %v141_v52, %v169_v40  ;;  %v3072_v40 = vld [vmem:[#allocation2 + $0x44] ss:$16 sps:$4 sm:$0xff]  }
  0xbd   :  { %v3090_v52 = vld [vmem:[#allocation2 + $0xa4] ss:$16 sps:$4 sm:$0xff]  }
  0xbe   :  { %v151_v59 = vpop.xlane.xlu1 %150  ;;  %v249_v15 = vsel %vm176_vm1, %v248_v62, %v244_v63 }
  0xbf   :  { %v131_v3 = vpop.xlane.xlu0 %130  ;;  %v253_v5 = vrot.slane %v151_v59, %v181_v43  ;;  %v3097_v59 = vld [vmem:[#allocation2 + $0xc8] ss:$16 sps:$4 sm:$0xff]  }
  0xc0   :  { %v234_v12 = vrot.slane %v131_v3, %v181_v43  ;;  %v3073_v43 = vld [vmem:[#allocation2 + $0x48] ss:$16 sps:$4 sm:$0xff]  }
  0xc1   :  { %v254_v6 = vsel %vm183_vm2, %v253_v5, %v249_v15  ;;  %v3106_v15 = vld [vmem:[#allocation2 + $0x100] ss:$16 sps:$4 sm:$0xff]  }
  0xc2   :  { %v156_v0 = vpop.xlane.xlu1 %155  ;;  %v235_v19 = vsel %vm183_vm2, %v234_v12, %v230_v17  ;;  %v3102_v12 = vld [vmem:[#allocation2 + $0xe4] ss:$16 sps:$4 sm:$0xff]  }
  0xc3   :  { %v258_v16 = vrot.slane %v156_v0, %v188_v50  ;;  %v136_v11 = vpop.xlane.xlu0 %135  ;;  %v3103_v0 = vld [vmem:[#allocation2 + $0xe8] ss:$16 sps:$4 sm:$0xff]  }
  0xc4   :  { %v239_v18 = vrot.slane %v136_v11, %v188_v50  ;;  %v3082_v50 = vld [vmem:[#allocation2 + $0x80] ss:$16 sps:$4 sm:$0xff]   ;;  %v3738_v11 = vsub.s32 0, %v3708_v34 }
  0xc5   :  { %v259_v20 = vsel %vm190_vm3, %v258_v16, %v254_v6  ;;  %v3109_v16 = vld [vmem:[#allocation2 + $0x108] ss:$16 sps:$4 sm:$0xff]   ;;  %v3742_v6 = vsub.s32 1, %v3708_v34 }
  0xc6   :  { %v240_v21 = vsel %vm190_vm3, %v239_v18, %v235_v19  ;;  %4171 = vst [vmem:[#allocation5_spill] sm:$0xff] %v3738_v11  ;;  %v3114_v18 = vld [vmem:[#allocation2 + $0x124] ss:$16 sps:$4 sm:$0xff]   ;;  %v3117_v19 = vld [vmem:[#allocation2 + $0x12c] ss:$16 sps:$4 sm:$0xff]  }
  0xc7   :  { %v261_v23 = vsel %vm260_vm5, %v259_v20, %v240_v21  ;;  %4172 = vst [vmem:[#allocation6_spill] sm:$0xff] %v3742_v6  ;;  %v3112_v20 = vld [vmem:[#allocation2 + $0x120] ss:$16 sps:$4 sm:$0xff]   ;;  %v3115_v21 = vld [vmem:[#allocation2 + $0x128] ss:$16 sps:$4 sm:$0xff]  }
  0xc8   :  { %v264_v24 = vsel %vm263_vm6, %v212_v22, %v261_v23  ;;  %v3120_v23 = vld [vmem:[#allocation2 + $0x144] ss:$16 sps:$4 sm:$0xff]  }
  0xc9   :  { %3014 = vmatmul.mubr.msk.f32.vlgmr.msra.gmra.mrb[0].mxu0 %vm276_vm7, %v264_v24  ;;  %v3123_v24 = vld [vmem:[#allocation2 + $0x14c] ss:$16 sps:$4 sm:$0xff]  }
  0xca   :  { %2409 = vmatpush1.bf16.msra.mxu0 %v3061_v33  ;;  %v3130_v33 = vld [vmem:[#allocation2 + $0x180] ss:$16 sps:$4 sm:$0xff]  }
  0xcb   :  { %2410 = vmatprep.subr.bf16.mxu0 %v3069_v37  ;;  %v3141_v37 = vld [vmem:[#allocation2 + $0x1ac] ss:$16 sps:$4 sm:$0xff]  }
  0xce   :  { %2411 = vmatpush1.bf16.msra.mxu0 %v3067_v39  ;;  %v3139_v39 = vld [vmem:[#allocation2 + $0x1a8] ss:$16 sps:$4 sm:$0xff]  }
  0xcf   :  { %2412 = vmatprep.subr.bf16.mxu0 %v3075_v41  ;;  %v3147_v41 = vld [vmem:[#allocation2 + $0x1cc] ss:$16 sps:$4 sm:$0xff]  }
  0xd2   :  { %2413 = vmatpush1.bf16.msra.mxu0 %v3073_v43  ;;  %v3145_v43 = vld [vmem:[#allocation2 + $0x1c8] ss:$16 sps:$4 sm:$0xff]  }
  0xd3   :  { %2414 = vmatprep.subr.bf16.mxu0 %v3081_v45  ;;  %v3153_v45 = vld [vmem:[#allocation2 + $0x1ec] ss:$16 sps:$4 sm:$0xff]  }
  0xd6   :  { %2415 = vmatpush1.bf16.msra.mxu0 %v3079_v47  ;;  %v3151_v47 = vld [vmem:[#allocation2 + $0x1e8] ss:$16 sps:$4 sm:$0xff]  }
  0xd7   :  { %2416 = vmatprep.subr.bf16.mxu0 %v3087_v49  ;;  %v3159_v49 = vld [vmem:[#allocation2 + $0x20c] ss:$16 sps:$4 sm:$0xff]  }
  0xda   :  { %2417 = vmatpush1.bf16.msra.mxu0 %v3085_v51 }
  0xdb   :  { %2418 = vmatprep.subr.bf16.mxu0 %v3093_v53 }
  0xde   :  { %2419 = vmatpush1.bf16.msra.mxu0 %v3091_v55 }
  0xdf   :  { %2420 = vmatprep.subr.bf16.mxu0 %v3099_v57 }
  0xe2   :  { %2421 = vmatpush1.bf16.msra.mxu0 %v3097_v59 }
  0xe3   :  { %2422 = vmatprep.subr.bf16.mxu0 %v3105_v7 }
  0xe6   :  { %2423 = vmatpush1.bf16.msra.mxu0 %v3103_v0 }
  0xe7   :  { %2424 = vmatprep.subr.bf16.mxu0 %v3111_v13 }
  0xea   :  { %2425 = vmatpush1.bf16.msra.mxu0 %v3109_v16  ;;  %v3471_v16 = vld [vmem:[%s4165_s5 + $0x60] sm:$0xff] }
  0xeb   :  { %2426 = vmatprep.subr.bf16.mxu0 %v3117_v19 }
  0xee   :  { %2427 = vmatpush1.bf16.msra.mxu0 %v3115_v21 }
  0xef   :  { %2428 = vmatprep.subr.bf16.mxu0 %v3123_v24 }
 0x19c   :  { %v346_v27 = vpop.f32.mrb[0].mxu0 }
 0x19d   :  { %v347_v28 = vadd.f32 %v2737_v26, %v346_v27  ;;  %v3015_v29 = vpop.f32.mrb[1].mxu0  ;;  %v3121_v26 = vld [vmem:[#allocation2 + $0x148] ss:$16 sps:$4 sm:$0xff]   ;;  %v3126_v27 = vld [vmem:[#allocation2 + $0x164] ss:$16 sps:$4 sm:$0xff]  }
 0x19e   :  { %2429 = vmatpush1.bf16.msra.mxu0 %v3121_v26  ;;  %v3124_v29 = vld [vmem:[#allocation2 + $0x160] ss:$16 sps:$4 sm:$0xff]  }
 0x19f   :  { %v350_v30 = vmax.f32 %v347_v28, 0.0  ;;  %v3129_v28 = vld [vmem:[#allocation2 + $0x16c] ss:$16 sps:$4 sm:$0xff]  }
 0x1a0   :  { %2430 = vmatprep.subr.bf16.mxu0 %v3129_v28 }
 0x1a1   :  { %3019 = vmatmul.mubr.msk.f32.vlgmr.msra.gmra.mrb[0].mxu1 %vm359_vm8, %v350_v30  ;;  %v3127_v30 = vld [vmem:[#allocation2 + $0x168] ss:$16 sps:$4 sm:$0xff]  }
 0x1a2   :  { %2245 = vmatpush1.bf16.msra.mxu1 %v3058_v31  ;;  %2431 = vmatpush1.bf16.msra.mxu0 %v3127_v30  ;;  %v3132_v31 = vld [vmem:[#allocation2 + $0x184] ss:$16 sps:$4 sm:$0xff]  }
 0x1a3   :  { %2246 = vmatprep.subr.bf16.mxu1 %v3066_v36  ;;  %2432 = vmatprep.subr.bf16.mxu0 %v3135_v32  ;;  %v3138_v36 = vld [vmem:[#allocation2 + $0x1a4] ss:$16 sps:$4 sm:$0xff]  }
 0x1a6   :  { %2247 = vmatpush1.bf16.msra.mxu1 %v3064_v38  ;;  %2433 = vmatpush1.bf16.msra.mxu0 %v3133_v35  ;;  %v3136_v38 = vld [vmem:[#allocation2 + $0x1a0] ss:$16 sps:$4 sm:$0xff]  }
 0x1a7   :  { %2248 = vmatprep.subr.bf16.mxu1 %v3072_v40  ;;  %2434 = vmatprep.subr.bf16.mxu0 %v3141_v37  ;;  %v3144_v40 = vld [vmem:[#allocation2 + $0x1c4] ss:$16 sps:$4 sm:$0xff]  }
 0x1aa   :  { %2249 = vmatpush1.bf16.msra.mxu1 %v3070_v42  ;;  %2435 = vmatpush1.bf16.msra.mxu0 %v3139_v39  ;;  %v3142_v42 = vld [vmem:[#allocation2 + $0x1c0] ss:$16 sps:$4 sm:$0xff]  }
 0x1ab   :  { %2250 = vmatprep.subr.bf16.mxu1 %v3078_v44  ;;  %2436 = vmatprep.subr.bf16.mxu0 %v3147_v41  ;;  %v3150_v44 = vld [vmem:[#allocation2 + $0x1e4] ss:$16 sps:$4 sm:$0xff]  }
 0x1ae   :  { %2251 = vmatpush1.bf16.msra.mxu1 %v3076_v46  ;;  %v3148_v46 = vld [vmem:[#allocation2 + $0x1e0] ss:$16 sps:$4 sm:$0xff]   ;;  %2437 = vmatpush1.bf16.msra.mxu0 %v3145_v43 }
 0x1af   :  { %2252 = vmatprep.subr.bf16.mxu1 %v3084_v48  ;;  %2438 = vmatprep.subr.bf16.mxu0 %v3153_v45  ;;  %v3156_v48 = vld [vmem:[#allocation2 + $0x204] ss:$16 sps:$4 sm:$0xff]   ;;  %v3480_v45 = vld [vmem:[%s4165_s5 + $0xc8] sm:$0xff] }
 0x1b0   :  { %v3479_v43 = vld [vmem:[%s4165_s5 + $0xc0] sm:$0xff] }
 0x1b2   :  { %2253 = vmatpush1.bf16.msra.mxu1 %v3082_v50  ;;  %2439 = vmatpush1.bf16.msra.mxu0 %v3151_v47  ;;  %v3481_v47 = vld [vmem:[%s4165_s5 + $0x98] sm:$0xff] }
 0x1b3   :  { %2254 = vmatprep.subr.bf16.mxu1 %v3090_v52  ;;  %2449 = vmatprep.subr.bf16.mxu0 %v3159_v49  ;;  %v3482_v49 = vld [vmem:[%s4165_s5 + $0xd8] sm:$0xff] }
 0x1b6   :  { %2255 = vmatpush1.bf16.msra.mxu1 %v3088_v54  ;;  %v3462_v54 = vld [vmem:[%s4165_s5 + $0x20] sm:$0xff] }
 0x1b7   :  { %2256 = vmatprep.subr.bf16.mxu1 %v3096_v56  ;;  %v3463_v56 = vld [vmem:[%s4165_s5] sm:$0xff] }
 0x1ba   :  { %2257 = vmatpush1.bf16.msra.mxu1 %v3094_v58  ;;  %v3464_v58 = vld [vmem:[%s4165_s5 + $0x28] sm:$0xff] }
 0x1bb   :  { %2258 = vmatprep.subr.bf16.mxu1 %v3102_v12  ;;  %v3469_v12 = vld [vmem:[%s4165_s5 + $0x48] sm:$0xff] }
 0x1be   :  { %2259 = vmatpush1.bf16.msra.mxu1 %v3100_v14  ;;  %v3470_v14 = vld [vmem:[%s4165_s5 + $0x58] sm:$0xff] }
 0x1bf   :  { %2260 = vmatprep.subr.bf16.mxu1 %v3108_v1 }
 0x1c2   :  { %2261 = vmatpush1.bf16.msra.mxu1 %v3106_v15 }
 0x1c3   :  { %2262 = vmatprep.subr.bf16.mxu1 %v3114_v18 }
 0x1c6   :  { %2263 = vmatpush1.bf16.msra.mxu1 %v3112_v20  ;;  %v3473_v20 = vld [vmem:[%s4165_s5 + $0x78] sm:$0xff] }
 0x1c7   :  { %2264 = vmatprep.subr.bf16.mxu1 %v3120_v23 }
 0x1ca   :  { %2265 = vmatpush1.bf16.msra.mxu1 %v3118_v25 }
 0x1cb   :  { %2266 = vmatprep.subr.bf16.mxu1 %v3126_v27 }
 0x1ce   :  { %2267 = vmatpush1.bf16.msra.mxu1 %v3124_v29  ;;  %v3474_v29 = vld [vmem:[%s4165_s5 + $0xa0] sm:$0xff] }
 0x1cf   :  { %2268 = vmatprep.subr.bf16.mxu1 %v3132_v31  ;;  %v3475_v31 = vld [vmem:[%s4165_s5 + $0xa8] sm:$0xff] }
 0x1d2   :  { %2269 = vmatpush1.bf16.msra.mxu1 %v3130_v33  ;;  %v3476_v33 = vld [vmem:[%s4165_s5 + $0x80] sm:$0xff] }
 0x1d3   :  { %2270 = vmatprep.subr.bf16.mxu1 %v3138_v36  ;;  %v3477_v36 = vld [vmem:[%s4165_s5 + $0x88] sm:$0xff] }
 0x1d6   :  { %2271 = vmatpush1.bf16.msra.mxu1 %v3136_v38  ;;  %v3478_v38 = vld [vmem:[%s4165_s5 + $0xb8] sm:$0xff] }
 0x1d7   :  { %2272 = vmatprep.subr.bf16.mxu1 %v3144_v40 }
 0x1da   :  { %2273 = vmatpush1.bf16.msra.mxu1 %v3142_v42 }
 0x1db   :  { %2274 = vmatprep.subr.bf16.mxu1 %v3150_v44 }
 0x1de   :  { %2275 = vmatpush1.bf16.msra.mxu1 %v3148_v46 }
 0x1df   :  { %2285 = vmatprep.subr.bf16.mxu1 %v3156_v48 }
 0x274   :  { %v432_v61 = vpop.f32.mrb[0].mxu1 }
 0x275   :  { %v433_v62 = vadd.f32 %v2739_v60, %v432_v61  ;;  %v3020_v63 = vpop.f32.mrb[1].mxu1  ;;  %v3465_v60 = vld [vmem:[%s4165_s5 + $0x8] sm:$0xff] }
 0x277   :  { %v437_v3 = vrot.slane %v433_v62, 2 }
 0x279   :  { %v439_v8 = vadd.f32 %v437_v3, %v433_v62  ;;  %v3466_v62 = vld [vmem:[%s4165_s5 + $0x40] sm:$0xff]  ;;  %v3467_v3 = vld [vmem:[%s4165_s5 + $0x38] sm:$0xff] }
 0x27b   :  { %v440_v10 = vsub.f32 0.0, %v439_v8 }
 0x27d   :  { %v441_v4 = vmul.f32 1.442695, %v440_v10  ;;  %v3468_v10 = vld [vmem:[%s4165_s5 + $0x18] sm:$0xff] }
 0x27f   :  { %3442 = vpow2.f32 %v441_v4 }
 0x289   :  { %v3443_v5 = vpop.eup %3442 }
 0x28a   :  { %v443_v9 = vadd.f32 1.0, %v3443_v5 }
 0x28c   :  { %3444 = vrcp.f32 %v443_v9 }
 0x296   :  { %v3445_v2 = vpop.eup %3444 }
 0x297   :  { %v449_v17 = vrot.slane %v3445_v2, %v3738_v11  ;;  %v468_v22 = vrot.slane %v3445_v2, %v3742_v6 }
 0x299   :  { %455 = vbcast.lane.b32.xlu1 %v449_v17, 264  ;;  %451 = vbcast.lane.b32.xlu0 %v449_v17, 256 }
 0x29d   :  { %470 = vbcast.lane.b32.xlu1 %v468_v22, 256  ;;  %459 = vbcast.lane.b32.xlu0 %v449_v17, 272 }
 0x2a1   :  { %474 = vbcast.lane.b32.xlu1 %v468_v22, 264  ;;  %463 = vbcast.lane.b32.xlu0 %v449_v17, 280  ;;  %v3472_v17 = vld [vmem:[%s4165_s5 + $0x68] sm:$0xff] }
 0x2a5   :  { %478 = vbcast.lane.b32.xlu1 %v468_v22, 272 }
 0x2a9   :  { %482 = vbcast.lane.b32.xlu1 %v468_v22, 280 }
 0x30b   :  { %v3745_v50 = vpop.permute.xlu0 %451  ;;  %v3747_v51 = vpop.permute.xlu1 %455 }
 0x30c   :  { %v3757_v55 = vmul.f32 %v3462_v54, %v3747_v51  ;;  %v3763_v57 = vmul.f32 %v3463_v56, %v3745_v50  ;;  %v3769_v59 = vmul.f32 %v3464_v58, %v3747_v51  ;;  %v3775_v61 = vmul.f32 %v3465_v60, %v3745_v50 }
 0x30d   :  { %v3787_v8 = vmul.f32 %v3467_v3, %v3747_v51  ;;  %v3793_v4 = vmul.f32 %v3468_v10, %v3745_v50 }
 0x30e   :  { %v516_v9 = vadd.f32 %v3757_v55, %v3763_v57  ;;  %v525_v13 = vadd.f32 %v3769_v59, %v3775_v61 }
 0x30f   :  { %v3749_v52 = vpop.permute.xlu0 %459  ;;  %v3751_v53 = vpop.permute.xlu1 %470  ;;  %v543_v19 = vadd.f32 %v3787_v8, %v3793_v4 }
 0x310   :  { %v3781_v63 = vmul.f32 %v3466_v62, %v3749_v52  ;;  %v3803_v7 = vmul.f32 %v3469_v12, %v3749_v52  ;;  %v3809_v0 = vmul.f32 %v3470_v14, %v3749_v52  ;;  %v3859_v35 = vmul.f32 %v3476_v33, %v3751_v53 }
 0x311   :  { %v3865_v37 = vmul.f32 %v3477_v36, %v3751_v53  ;;  %v3889_v48 = vmul.f32 %v3481_v47, %v3751_v53 }
 0x312   :  { %v517_v15 = vadd.f32 %v516_v9, %v3781_v63  ;;  %v526_v22 = vadd.f32 %v525_v13, %v3803_v7  ;;  %v544_v24 = vadd.f32 %v543_v19, %v3809_v0 }
 0x313   :  { %v3795_v5 = vpop.permute.xlu0 %463  ;;  %v3811_v1 = vpop.permute.xlu1 %474 }
 0x314   :  { %v3820_v2 = vmul.f32 %v3471_v16, %v3795_v5  ;;  %v3826_v18 = vmul.f32 %v3472_v17, %v3795_v5  ;;  %v3834_v21 = vmul.f32 %v3473_v20, %v3795_v5  ;;  %v3847_v30 = vmul.f32 %v3474_v29, %v3811_v1  ;;  %v3484_v17 = vld [vmem:[%s4165_s5 + $0xe8] sm:$0xff]  ;;  %v3485_v20 = vld [vmem:[%s4165_s5 + $0xf8] sm:$0xff] }
 0x315   :  { %v3853_v32 = vmul.f32 %v3475_v31, %v3811_v1  ;;  %v3871_v39 = vmul.f32 %v3478_v38, %v3811_v1 }
 0x316   :  { %v518_v23 = vadd.f32 %v517_v15, %v3820_v2  ;;  %v527_v25 = vadd.f32 %v526_v22, %v3826_v18  ;;  %v545_v27 = vadd.f32 %v544_v24, %v3834_v21  ;;  %v552_v56 = vadd.f32 %v3847_v30, %v3859_v35  ;;  %v3483_v15 = vld [vmem:[%s4165_s5 + $0xe0] sm:$0xff] }
 0x317   :  { %v3841_v28 = vpop.permute.xlu1 %478  ;;  %v561_v58 = vadd.f32 %v3853_v32, %v3865_v37  ;;  %v579_v62 = vadd.f32 %v3871_v39, %v3889_v48 }
 0x318   :  { %v519_v26 = vrot.slane %v518_v23, 4  ;;  %v528_v40 = vrot.slane %v527_v25, 4  ;;  %v546_v42 = vrot.slane %v545_v27, 4  ;;  %v3877_v44 = vmul.f32 %v3479_v43, %v3841_v28 }
 0x319   :  { %v3883_v46 = vmul.f32 %v3480_v45, %v3841_v28  ;;  %v3895_v54 = vmul.f32 %v3482_v49, %v3841_v28 }
 0x31a   :  { %v520_v41 = vadd.f32 %v519_v26, %v518_v23  ;;  %v529_v3 = vadd.f32 %v528_v40, %v527_v25  ;;  %v547_v9 = vadd.f32 %v546_v42, %v545_v27  ;;  %v553_v12 = vadd.f32 %v552_v56, %v3877_v44 }
 0x31b   :  { %v3901_v60 = vpop.permute.xlu1 %482  ;;  %v562_v14 = vadd.f32 %v561_v58, %v3883_v46  ;;  %v580_v13 = vadd.f32 %v579_v62, %v3895_v54 }
 0x31c   :  { %v521_v10 = vrot.slane %v520_v41, 2  ;;  %v3912_v16 = vmul.f32 %v3483_v15, %v3901_v60  ;;  %v3918_v19 = vmul.f32 %v3484_v17, %v3901_v60  ;;  %v3924_v22 = vmul.f32 %v3485_v20, %v3901_v60 }
 0x31d   :  { %v530_v23 = vrot.slane %v529_v3, 2  ;;  %v548_v27 = vrot.slane %v547_v9, 2 }
 0x31e   :  { %v554_v24 = vadd.f32 %v553_v12, %v3912_v16  ;;  %v563_v25 = vadd.f32 %v562_v14, %v3918_v19  ;;  %v581_v26 = vadd.f32 %v580_v13, %v3924_v22  ;;  %v522_v29 = vadd.f32 %v521_v10, %v520_v41 }
 0x31f   :  { %v531_v43 = vadd.f32 %v530_v23, %v529_v3  ;;  %v549_v45 = vadd.f32 %v548_v27, %v547_v9 }
 0x320   :  { %v555_v31 = vrot.slane %v554_v24, 4  ;;  %v564_v33 = vrot.slane %v563_v25, 4  ;;  %v582_v36 = vrot.slane %v581_v26, 4  ;;  %v523_v47 = vrot.slane %v522_v29, 1 }
 0x321   :  { %v532_v12 = vrot.slane %v531_v43, 1  ;;  %v550_v14 = vrot.slane %v549_v45, 1 }
 0x322   :  { %v556_v38 = vadd.f32 %v555_v31, %v554_v24  ;;  %v565_v40 = vadd.f32 %v564_v33, %v563_v25  ;;  %v583_v42 = vadd.f32 %v582_v36, %v581_v26  ;;  %v524_v41 = vadd.f32 %v523_v47, %v522_v29  ;;  %v3165_v47 = vld [vmem:[#allocation2 + $0x22c] ss:$16 sps:$4 sm:$0xff]  }
 0x323   :  { %v533_v13 = vadd.f32 %v532_v12, %v531_v43  ;;  %v551_v24 = vadd.f32 %v550_v14, %v549_v45  ;;  %v3162_v45 = vld [vmem:[#allocation2 + $0x224] ss:$16 sps:$4 sm:$0xff]   ;;  %v3166_v12 = vld [vmem:[#allocation2 + $0x240] ss:$16 sps:$4 sm:$0xff]  }
 0x324   :  { %v557_v49 = vrot.slane %v556_v38, 2  ;;  %v566_v56 = vrot.slane %v565_v40, 2  ;;  %v584_v58 = vrot.slane %v583_v42, 2  ;;  %v588_v9 = vmul.f32 0.03125, %v524_v41  ;;  %v3174_v14 = vld [vmem:[#allocation2 + $0x264] ss:$16 sps:$4 sm:$0xff]  }
 0x325   :  { %v589_v26 = vmul.f32 0.03125, %v533_v13  ;;  %v3172_v13 = vld [vmem:[#allocation2 + $0x260] ss:$16 sps:$4 sm:$0xff]   ;;  %v3180_v41 = vld [vmem:[#allocation2 + $0x284] ss:$16 sps:$4 sm:$0xff]  }
 0x326   :  { %v558_v62 = vadd.f32 %v557_v49, %v556_v38  ;;  %v567_v15 = vadd.f32 %v566_v56, %v565_v40  ;;  %v585_v10 = vadd.f32 %v584_v58, %v583_v42  ;;  %v3154_v38 = vld [vmem:[#allocation2 + $0x200] ss:$16 sps:$4 sm:$0xff]   ;;  %v3157_v40 = vld [vmem:[#allocation2 + $0x208] ss:$16 sps:$4 sm:$0xff]   ;;  %v591_v49 = vmul.f32 0.03125, %v551_v24 }
 0x327   :  { %v3163_v56 = vld [vmem:[#allocation2 + $0x228] ss:$16 sps:$4 sm:$0xff]   ;;  %v3168_v58 = vld [vmem:[#allocation2 + $0x244] ss:$16 sps:$4 sm:$0xff]   ;;  %v3178_v24 = vld [vmem:[#allocation2 + $0x280] ss:$16 sps:$4 sm:$0xff]  }
 0x328   :  { %v559_v17 = vrot.slane %v558_v62, 1  ;;  %v568_v20 = vrot.slane %v567_v15, 1  ;;  %v586_v25 = vrot.slane %v585_v10, 1 }
 0x32a   :  { %v569_v6 = vadd.f32 %v568_v20, %v567_v15  ;;  %v560_v11 = vadd.f32 %v559_v17, %v558_v62  ;;  %v587_v27 = vadd.f32 %v586_v25, %v585_v10  ;;  %v3171_v62 = vld [vmem:[#allocation2 + $0x24c] ss:$16 sps:$4 sm:$0xff]   ;;  %v3169_v15 = vld [vmem:[#allocation2 + $0x248] ss:$16 sps:$4 sm:$0xff]  }
 0x32b   :  { %v3177_v17 = vld [vmem:[#allocation2 + $0x26c] ss:$16 sps:$4 sm:$0xff]   ;;  %v3175_v20 = vld [vmem:[#allocation2 + $0x268] ss:$16 sps:$4 sm:$0xff]  }
 0x32c   :  { %v593_v3 = vmul.f32 0.03125, %v569_v6  ;;  %v592_v23 = vmul.f32 0.03125, %v560_v11  ;;  %v595_v29 = vmul.f32 0.03125, %v587_v27  ;;  %v3160_v6 = vld [vmem:[#allocation2 + $0x220] ss:$16 sps:$4 sm:$0xff]  }
 0x32d   :  { %v3183_v10 = vld [vmem:[#allocation2 + $0x28c] ss:$16 sps:$4 sm:$0xff]   ;;  %v3181_v25 = vld [vmem:[#allocation2 + $0x288] ss:$16 sps:$4 sm:$0xff]   ;;  %v3192_v27 = vld [vmem:[#allocation2 + $0x2c4] ss:$16 sps:$4 sm:$0xff]  }
 0x32e   :  { %v677_v31 = vsel %vm211_vm4, %v593_v3, %v589_v26  ;;  %v676_v33 = vsel %vm211_vm4, %v592_v23, %v588_v9  ;;  %v679_v42 = vsel %vm211_vm4, %v595_v29, %v591_v49  ;;  %v3186_v26 = vld [vmem:[#allocation2 + $0x2a4] ss:$16 sps:$4 sm:$0xff]   ;;  %v3189_v3 = vld [vmem:[#allocation2 + $0x2ac] ss:$16 sps:$4 sm:$0xff]   ;;  %v3184_v9 = vld [vmem:[#allocation2 + $0x2a0] ss:$16 sps:$4 sm:$0xff]  }
 0x32f   :  { %v701_v36 = vpack.c.bf16 %v677_v31, %v677_v31  ;;  %v700_v43 = vpack.c.bf16 %v676_v33, %v676_v33  ;;  %v703_v11 = vpack.c.bf16 %v679_v42, %v679_v42  ;;  %v3187_v23 = vld [vmem:[#allocation2 + $0x2a8] ss:$16 sps:$4 sm:$0xff]   ;;  %v3195_v31 = vld [vmem:[#allocation2 + $0x2cc] ss:$16 sps:$4 sm:$0xff]   ;;  %v3486_v33 = vld [vmem:[%s4165_s5 + $0xb0] sm:$0xff] }
 0x330   :  { %v3489_v29 = vld [vmem:[%s4165_s5 + $0x90] sm:$0xff] }
 0x331   :  { %2276 = vmatprep.mubr.bf16.mxu1 %v701_v36  ;;  %2440 = vmatprep.mubr.bf16.mxu0 %v701_v36  ;;  %v3936_v36 = vmul.f32 %v3486_v33, %v3811_v1  ;;  %v3954_v1 = vmul.f32 %v3489_v29, %v3751_v53  ;;  %v3490_v42 = vld [vmem:[%s4165_s5 + $0xd0] sm:$0xff]  ;;  %v3211_v29 = vld [vmem:[#allocation2 + $0x328] ss:$16 sps:$4 sm:$0xff]  }
 0x332   :  { %2277 = vmatmul.mubr.bf16.vlgmr.msra.gmra.mrb[4].mxu1 %v700_v43  ;;  %2441 = vmatmul.mubr.bf16.vlgmr.msra.gmra.mrb[4].mxu0 %v700_v43  ;;  %v3488_v43 = vld [vmem:[%s4165_s5 + $0x10] sm:$0xff] }
 0x333   :  { %2286 = vmatpush1.bf16.msra.mxu1 %v3154_v38  ;;  %2450 = vmatpush1.bf16.msra.mxu0 %v3157_v40  ;;  %v3487_v38 = vld [vmem:[%s4165_s5 + $0x30] sm:$0xff]  ;;  %v3948_v49 = vmul.f32 %v3488_v43, %v3745_v50 }
 0x334   :  { %2317 = vmatprep.mubr.bf16.mxu1 %v703_v11  ;;  %2481 = vmatprep.mubr.bf16.mxu0 %v703_v11  ;;  %v3942_v40 = vmul.f32 %v3487_v38, %v3747_v51  ;;  %v3960_v51 = vmul.f32 %v3490_v42, %v3841_v28  ;;  %v3198_v50 = vld [vmem:[#allocation2 + $0x2e4] ss:$16 sps:$4 sm:$0xff]   ;;  %v3201_v11 = vld [vmem:[#allocation2 + $0x2ec] ss:$16 sps:$4 sm:$0xff]   ;;  %v3208_v43 = vld [vmem:[#allocation2 + $0x320] ss:$16 sps:$4 sm:$0xff]  }
 0x335   :  { %2287 = vmatprep.subr.bf16.mxu1 %v3162_v45  ;;  %2451 = vmatprep.subr.bf16.mxu0 %v3165_v47  ;;  %v3190_v45 = vld [vmem:[#allocation2 + $0x2c0] ss:$16 sps:$4 sm:$0xff]   ;;  %v3193_v47 = vld [vmem:[#allocation2 + $0x2c8] ss:$16 sps:$4 sm:$0xff]  }
 0x336   :  { %v3491_v53 = vld [vmem:[%s4165_s5 + $0x50] sm:$0xff] }
 0x337   :  { %2288 = vmatpush1.bf16.msra.mxu1 %v3160_v6  ;;  %2452 = vmatpush1.bf16.msra.mxu0 %v3163_v56  ;;  %v3966_v6 = vmul.f32 %v3491_v53, %v3749_v52  ;;  %v570_v56 = vadd.f32 %v3936_v36, %v3954_v1  ;;  %v3492_v28 = vld [vmem:[%s4165_s5 + $0xf0] sm:$0xff] }
 0x338   :  { %2289 = vmatprep.subr.bf16.mxu1 %v3168_v58  ;;  %2453 = vmatprep.subr.bf16.mxu0 %v3171_v62  ;;  %v3974_v58 = vmul.f32 %v3492_v28, %v3901_v60  ;;  %v534_v62 = vadd.f32 %v3942_v40, %v3948_v49  ;;  %v3204_v60 = vld [vmem:[#allocation2 + $0x304] ss:$16 sps:$4 sm:$0xff]   ;;  %v3217_v28 = vld [vmem:[#allocation2 + $0x348] ss:$16 sps:$4 sm:$0xff]  }
 0x33b   :  { %2290 = vmatpush1.bf16.msra.mxu1 %v3166_v12  ;;  %2454 = vmatpush1.bf16.msra.mxu0 %v3169_v15  ;;  %v3493_v12 = vld [vmem:[%s4165_s5 + $0x70] sm:$0xff]  ;;  %v571_v15 = vadd.f32 %v570_v56, %v3960_v51 }
 0x33c   :  { %2291 = vmatprep.subr.bf16.mxu1 %v3174_v14  ;;  %2455 = vmatprep.subr.bf16.mxu0 %v3177_v17  ;;  %v3982_v52 = vmul.f32 %v3493_v12, %v3795_v5  ;;  %v3196_v14 = vld [vmem:[#allocation2 + $0x2e0] ss:$16 sps:$4 sm:$0xff]   ;;  %v3199_v17 = vld [vmem:[#allocation2 + $0x2e8] ss:$16 sps:$4 sm:$0xff]   ;;  %v3222_v12 = vld [vmem:[#allocation2 + $0x364] ss:$16 sps:$4 sm:$0xff]  }
 0x33d   :  { %v3214_v56 = vld [vmem:[#allocation2 + $0x340] ss:$16 sps:$4 sm:$0xff]  }
 0x33f   :  { %2292 = vmatpush1.bf16.msra.mxu1 %v3172_v13  ;;  %2456 = vmatpush1.bf16.msra.mxu0 %v3175_v20  ;;  %v3207_v13 = vld [vmem:[#allocation2 + $0x30c] ss:$16 sps:$4 sm:$0xff]   ;;  %v535_v20 = vadd.f32 %v534_v62, %v3966_v6 }
 0x340   :  { %2293 = vmatprep.subr.bf16.mxu1 %v3180_v41  ;;  %2457 = vmatprep.subr.bf16.mxu0 %v3183_v10  ;;  %v572_v41 = vadd.f32 %v571_v15, %v3974_v58  ;;  %v641_v10 = vmin.f32 %v3865_v37, %v3853_v32  ;;  %v3225_v15 = vld [vmem:[#allocation2 + $0x36c] ss:$16 sps:$4 sm:$0xff]  }
 0x341   :  { %v536_v5 = vadd.f32 %v535_v20, %v3982_v52  ;;  %v3223_v20 = vld [vmem:[#allocation2 + $0x368] ss:$16 sps:$4 sm:$0xff]  }
 0x343   :  { %2294 = vmatpush1.bf16.msra.mxu1 %v3178_v24  ;;  %2458 = vmatpush1.bf16.msra.mxu0 %v3181_v25  ;;  %v3202_v24 = vld [vmem:[#allocation2 + $0x300] ss:$16 sps:$4 sm:$0xff]   ;;  %v3205_v25 = vld [vmem:[#allocation2 + $0x308] ss:$16 sps:$4 sm:$0xff]   ;;  %v537_v38 = vrot.slane %v536_v5, 4 }
 0x344   :  { %2295 = vmatprep.subr.bf16.mxu1 %v3186_v26  ;;  %2459 = vmatprep.subr.bf16.mxu0 %v3189_v3  ;;  %v605_v26 = vmin.f32 %v3775_v61, %v3769_v59  ;;  %v642_v3 = vmin.f32 %v641_v10, %v3883_v46 }
 0x345   :  { %v538_v53 = vadd.f32 %v537_v38, %v536_v5  ;;  %v3231_v5 = vld [vmem:[#allocation2 + $0x38c] ss:$16 sps:$4 sm:$0xff]  }
 0x346   :  { %v643_v33 = vmin.f32 %v642_v3, %v3918_v19  ;;  %v3226_v3 = vld [vmem:[#allocation2 + $0x380] ss:$16 sps:$4 sm:$0xff]  }
 0x347   :  { %2296 = vmatpush1.bf16.msra.mxu1 %v3184_v9  ;;  %2460 = vmatpush1.bf16.msra.mxu0 %v3187_v23  ;;  %v3210_v9 = vld [vmem:[#allocation2 + $0x324] ss:$16 sps:$4 sm:$0xff]   ;;  %v3213_v23 = vld [vmem:[#allocation2 + $0x32c] ss:$16 sps:$4 sm:$0xff]  }
 0x348   :  { %2297 = vmatprep.subr.bf16.mxu1 %v3192_v27  ;;  %2461 = vmatprep.subr.bf16.mxu0 %v3195_v31  ;;  %v573_v27 = vrot.slane %v572_v41, 4  ;;  %v606_v31 = vmin.f32 %v605_v26, %v3803_v7 }
 0x34a   :  { %v607_v42 = vmin.f32 %v606_v31, %v3826_v18  ;;  %v3237_v31 = vld [vmem:[#allocation2 + $0x3ac] ss:$16 sps:$4 sm:$0xff]  }
 0x34b   :  { %2298 = vmatpush1.bf16.msra.mxu1 %v3190_v45  ;;  %2462 = vmatpush1.bf16.msra.mxu0 %v3193_v47  ;;  %v3216_v45 = vld [vmem:[#allocation2 + $0x344] ss:$16 sps:$4 sm:$0xff]   ;;  %v3219_v47 = vld [vmem:[#allocation2 + $0x34c] ss:$16 sps:$4 sm:$0xff]  }
 0x34c   :  { %2299 = vmatprep.subr.bf16.mxu1 %v3198_v50  ;;  %2463 = vmatprep.subr.bf16.mxu0 %v3201_v11  ;;  %v574_v50 = vadd.f32 %v573_v27, %v572_v41  ;;  %v644_v11 = vrot.slane %v643_v33, 4  ;;  %v608_v62 = vrot.slane %v607_v42, 4  ;;  %v3228_v41 = vld [vmem:[#allocation2 + $0x384] ss:$16 sps:$4 sm:$0xff]  }
 0x34d   :  { %v3234_v27 = vld [vmem:[#allocation2 + $0x3a4] ss:$16 sps:$4 sm:$0xff]  }
 0x34e   :  { %v609_v10 = vmin.f32 %v607_v42, %v608_v62  ;;  %v3235_v42 = vld [vmem:[#allocation2 + $0x3a8] ss:$16 sps:$4 sm:$0xff]  }
 0x34f   :  { %2300 = vmatpush1.bf16.msra.mxu1 %v3196_v14  ;;  %2464 = vmatpush1.bf16.msra.mxu0 %v3199_v17  ;;  %v575_v14 = vrot.slane %v574_v50, 2  ;;  %v645_v17 = vmin.f32 %v643_v33, %v644_v11 }
 0x350   :  { %2301 = vmatprep.subr.bf16.mxu1 %v3204_v60  ;;  %2465 = vmatprep.subr.bf16.mxu0 %v3207_v13  ;;  %v539_v60 = vrot.slane %v538_v53, 2  ;;  %v3220_v13 = vld [vmem:[#allocation2 + $0x360] ss:$16 sps:$4 sm:$0xff]  }
 0x352   :  { %v540_v26 = vadd.f32 %v539_v60, %v538_v53 }
 0x353   :  { %2302 = vmatpush1.bf16.msra.mxu1 %v3202_v24  ;;  %2466 = vmatpush1.bf16.msra.mxu0 %v3205_v25  ;;  %v576_v24 = vadd.f32 %v575_v14, %v574_v50  ;;  %v646_v25 = vrot.slane %v645_v17, 2 }
 0x354   :  { %2303 = vmatprep.subr.bf16.mxu1 %v3210_v9  ;;  %2467 = vmatprep.subr.bf16.mxu0 %v3213_v23  ;;  %v3229_v9 = vld [vmem:[#allocation2 + $0x388] ss:$16 sps:$4 sm:$0xff]   ;;  %v610_v23 = vrot.slane %v609_v10, 2 }
 0x355   :  { %v577_v33 = vrot.slane %v576_v24, 1  ;;  %v647_v38 = vmin.f32 %v645_v17, %v646_v25 }
 0x356   :  { %v611_v50 = vmin.f32 %v609_v10, %v610_v23  ;;  %v3252_v10 = vld [vmem:[#allocation2 + $0x404] ss:$16 sps:$4 sm:$0xff]   ;;  %v3253_v23 = vld [vmem:[#allocation2 + $0x408] ss:$16 sps:$4 sm:$0xff]  }
 0x357   :  { %2304 = vmatpush1.bf16.msra.mxu1 %v3208_v43  ;;  %2468 = vmatpush1.bf16.msra.mxu0 %v3211_v29  ;;  %v541_v43 = vrot.slane %v540_v26, 1  ;;  %v3232_v29 = vld [vmem:[#allocation2 + $0x3a0] ss:$16 sps:$4 sm:$0xff]   ;;  %v578_v11 = vadd.f32 %v577_v33, %v576_v24  ;;  %v648_v53 = vrot.slane %v647_v38, 1  ;;  %v3261_v33 = vld [vmem:[#allocation2 + $0x42c] ss:$16 sps:$4 sm:$0xff]  }
 0x358   :  { %2305 = vmatprep.subr.bf16.mxu1 %v3216_v45  ;;  %2469 = vmatprep.subr.bf16.mxu0 %v3219_v47  ;;  %v3240_v45 = vld [vmem:[#allocation2 + $0x3c4] ss:$16 sps:$4 sm:$0xff]   ;;  %v3243_v47 = vld [vmem:[#allocation2 + $0x3cc] ss:$16 sps:$4 sm:$0xff]   ;;  %v612_v14 = vrot.slane %v611_v50, 1 }
 0x359   :  { %v542_v62 = vadd.f32 %v541_v43, %v540_v26  ;;  %v594_v17 = vmul.f32 0.03125, %v578_v11  ;;  %v649_v60 = vmin.f32 %v647_v38, %v648_v53  ;;  %v3256_v38 = vld [vmem:[#allocation2 + $0x420] ss:$16 sps:$4 sm:$0xff]   ;;  %v3259_v43 = vld [vmem:[#allocation2 + $0x428] ss:$16 sps:$4 sm:$0xff]  }
 0x35a   :  { %v613_v24 = vmin.f32 %v611_v50, %v612_v14  ;;  %v3270_v50 = vld [vmem:[#allocation2 + $0x464] ss:$16 sps:$4 sm:$0xff]   ;;  %v3273_v11 = vld [vmem:[#allocation2 + $0x46c] ss:$16 sps:$4 sm:$0xff]   ;;  %v3268_v53 = vld [vmem:[#allocation2 + $0x460] ss:$16 sps:$4 sm:$0xff]  }
 0x35b   :  { %2306 = vmatpush1.bf16.msra.mxu1 %v3214_v56  ;;  %2470 = vmatpush1.bf16.msra.mxu0 %v3217_v28  ;;  %v3238_v56 = vld [vmem:[#allocation2 + $0x3c0] ss:$16 sps:$4 sm:$0xff]   ;;  %v3241_v28 = vld [vmem:[#allocation2 + $0x3c8] ss:$16 sps:$4 sm:$0xff]   ;;  %v3282_v14 = vld [vmem:[#allocation2 + $0x4a4] ss:$16 sps:$4 sm:$0xff]  }
 0x35c   :  { %2307 = vmatprep.subr.bf16.mxu1 %v3222_v12  ;;  %2471 = vmatprep.subr.bf16.mxu0 %v3225_v15  ;;  %v3246_v12 = vld [vmem:[#allocation2 + $0x3e4] ss:$16 sps:$4 sm:$0xff]   ;;  %v3249_v15 = vld [vmem:[#allocation2 + $0x3ec] ss:$16 sps:$4 sm:$0xff]   ;;  %v693_v26 = vsel %vm211_vm4, %v649_v60, %v613_v24  ;;  %v3280_v60 = vld [vmem:[#allocation2 + $0x4a0] ss:$16 sps:$4 sm:$0xff]  }
 0x35d   :  { %v3294_v24 = vld [vmem:[#allocation2 + $0x4e4] ss:$16 sps:$4 sm:$0xff]  }
 0x35f   :  { %2308 = vmatpush1.bf16.msra.mxu1 %v3220_v13  ;;  %2472 = vmatpush1.bf16.msra.mxu0 %v3223_v20  ;;  %v3244_v13 = vld [vmem:[#allocation2 + $0x3e0] ss:$16 sps:$4 sm:$0xff]   ;;  %v3247_v20 = vld [vmem:[#allocation2 + $0x3e8] ss:$16 sps:$4 sm:$0xff]  }
 0x360   :  { %2309 = vmatprep.subr.bf16.mxu1 %v3228_v41  ;;  %2473 = vmatprep.subr.bf16.mxu0 %v3231_v5  ;;  %v590_v41 = vmul.f32 0.03125, %v542_v62  ;;  %v3255_v5 = vld [vmem:[#allocation2 + $0x40c] ss:$16 sps:$4 sm:$0xff]  }
 0x361   :  { %v3279_v62 = vld [vmem:[#allocation2 + $0x48c] ss:$16 sps:$4 sm:$0xff]  }
 0x362   :  { %v678_v25 = vsel %vm211_vm4, %v594_v17, %v590_v41  ;;  %v3285_v17 = vld [vmem:[#allocation2 + $0x4ac] ss:$16 sps:$4 sm:$0xff]  }
 0x363   :  { %2310 = vmatpush1.bf16.msra.mxu1 %v3226_v3  ;;  %2474 = vmatpush1.bf16.msra.mxu0 %v3229_v9  ;;  %v3250_v3 = vld [vmem:[#allocation2 + $0x400] ss:$16 sps:$4 sm:$0xff]   ;;  %v702_v9 = vpack.c.bf16 %v678_v25, %v678_v25  ;;  %v3291_v41 = vld [vmem:[#allocation2 + $0x4cc] ss:$16 sps:$4 sm:$0xff]  }
 0x364   :  { %2311 = vmatprep.subr.bf16.mxu1 %v3234_v27  ;;  %2475 = vmatprep.subr.bf16.mxu0 %v3237_v31  ;;  %v705_v27 = vpack.c.bf16 %v693_v26, %v693_v26  ;;  %v3258_v31 = vld [vmem:[#allocation2 + $0x424] ss:$16 sps:$4 sm:$0xff]   ;;  %v3297_v25 = vld [vmem:[#allocation2 + $0x4ec] ss:$16 sps:$4 sm:$0xff]   ;;  %v3292_v26 = vld [vmem:[#allocation2 + $0x4e0] ss:$16 sps:$4 sm:$0xff]  }
 0x367   :  { %2312 = vmatpush1.bf16.msra.mxu1 %v3232_v29  ;;  %2476 = vmatpush1.bf16.msra.mxu0 %v3235_v42  ;;  %v3264_v29 = vld [vmem:[#allocation2 + $0x444] ss:$16 sps:$4 sm:$0xff]   ;;  %v3267_v42 = vld [vmem:[#allocation2 + $0x44c] ss:$16 sps:$4 sm:$0xff]  }
 0x368   :  { %2313 = vmatprep.subr.bf16.mxu1 %v3240_v45  ;;  %2477 = vmatprep.subr.bf16.mxu0 %v3243_v47  ;;  %v3262_v45 = vld [vmem:[#allocation2 + $0x440] ss:$16 sps:$4 sm:$0xff]   ;;  %v3265_v47 = vld [vmem:[#allocation2 + $0x448] ss:$16 sps:$4 sm:$0xff]  }
 0x36b   :  { %2314 = vmatpush1.bf16.msra.mxu1 %v3238_v56  ;;  %2478 = vmatpush1.bf16.msra.mxu0 %v3241_v28  ;;  %v3271_v56 = vld [vmem:[#allocation2 + $0x468] ss:$16 sps:$4 sm:$0xff]   ;;  %v3276_v28 = vld [vmem:[#allocation2 + $0x484] ss:$16 sps:$4 sm:$0xff]  }
 0x36c   :  { %2315 = vmatprep.subr.bf16.mxu1 %v3246_v12  ;;  %2479 = vmatprep.subr.bf16.mxu0 %v3249_v15  ;;  %v3274_v12 = vld [vmem:[#allocation2 + $0x480] ss:$16 sps:$4 sm:$0xff]   ;;  %v3277_v15 = vld [vmem:[#allocation2 + $0x488] ss:$16 sps:$4 sm:$0xff]  }
 0x36f   :  { %2316 = vmatpush1.bf16.msra.mxu1 %v3244_v13  ;;  %2480 = vmatpush1.bf16.msra.mxu0 %v3247_v20  ;;  %v3283_v13 = vld [vmem:[#allocation2 + $0x4a8] ss:$16 sps:$4 sm:$0xff]   ;;  %v3288_v20 = vld [vmem:[#allocation2 + $0x4c4] ss:$16 sps:$4 sm:$0xff]  }
 0x370   :  { %2326 = vmatprep.subr.bf16.mxu1 %v3252_v10  ;;  %2490 = vmatprep.subr.bf16.mxu0 %v3255_v5  ;;  %v3286_v10 = vld [vmem:[#allocation2 + $0x4c0] ss:$16 sps:$4 sm:$0xff]   ;;  %v3289_v5 = vld [vmem:[#allocation2 + $0x4c8] ss:$16 sps:$4 sm:$0xff]  }
 0x372   :  { %2318 = vmatmul.mubr.bf16.vlgmr.msra.gmra.mrb[4].mxu1 %v702_v9  ;;  %2482 = vmatmul.mubr.bf16.vlgmr.msra.gmra.mrb[4].mxu0 %v702_v9  ;;  %v3300_v9 = vld [vmem:[#allocation2 + $0x504] ss:$16 sps:$4 sm:$0xff]  }
 0x373   :  { %2327 = vmatpush1.bf16.msra.mxu1 %v3250_v3  ;;  %2358 = vmatprep.mubr.bf16.mxu1 %v705_v27  ;;  %v3295_v3 = vld [vmem:[#allocation2 + $0x4e8] ss:$16 sps:$4 sm:$0xff]  }
 0x374   :  { %2491 = vmatpush1.bf16.msra.mxu0 %v3253_v23  ;;  %2522 = vmatprep.mubr.bf16.mxu0 %v705_v27  ;;  %v632_v23 = vmin.f32 %v3859_v35, %v3847_v30  ;;  %v3303_v27 = vld [vmem:[#allocation2 + $0x50c] ss:$16 sps:$4 sm:$0xff]  }
 0x375   :  { %2328 = vmatprep.subr.bf16.mxu1 %v3258_v31  ;;  %2492 = vmatprep.subr.bf16.mxu0 %v3261_v33  ;;  %v596_v31 = vmin.f32 %v3763_v57, %v3757_v55  ;;  %v659_v33 = vmin.f32 %v3889_v48, %v3871_v39 }
 0x377   :  { %2329 = vmatpush1.bf16.msra.mxu1 %v3256_v38  ;;  %v633_v38 = vmin.f32 %v632_v23, %v3877_v44 }
 0x378   :  { %2493 = vmatpush1.bf16.msra.mxu0 %v3259_v43  ;;  %2330 = vmatprep.subr.bf16.mxu1 %v3264_v29  ;;  %v3298_v43 = vld [vmem:[#allocation2 + $0x500] ss:$16 sps:$4 sm:$0xff]   ;;  %v3301_v29 = vld [vmem:[#allocation2 + $0x508] ss:$16 sps:$4 sm:$0xff]  }
 0x379   :  { %2494 = vmatprep.subr.bf16.mxu0 %v3267_v42  ;;  %v3306_v42 = vld [vmem:[#allocation2 + $0x524] ss:$16 sps:$4 sm:$0xff]  }
 0x37b   :  { %2331 = vmatpush1.bf16.msra.mxu1 %v3262_v45  ;;  %v623_v45 = vmin.f32 %v3793_v4, %v3787_v8 }
 0x37c   :  { %2495 = vmatpush1.bf16.msra.mxu0 %v3265_v47  ;;  %2332 = vmatprep.subr.bf16.mxu1 %v3270_v50  ;;  %v597_v47 = vmin.f32 %v596_v31, %v3781_v63  ;;  %v660_v50 = vmin.f32 %v659_v33, %v3895_v54  ;;  %v3319_v31 = vld [vmem:[#allocation2 + $0x568] ss:$16 sps:$4 sm:$0xff]   ;;  %v3324_v33 = vld [vmem:[#allocation2 + $0x584] ss:$16 sps:$4 sm:$0xff]  }
 0x37d   :  { %2496 = vmatprep.subr.bf16.mxu0 %v3273_v11  ;;  %v634_v11 = vmin.f32 %v633_v38, %v3912_v16 }
 0x37f   :  { %2333 = vmatpush1.bf16.msra.mxu1 %v3268_v53  ;;  %v3309_v53 = vld [vmem:[#allocation2 + $0x52c] ss:$16 sps:$4 sm:$0xff]  }
 0x380   :  { %2497 = vmatpush1.bf16.msra.mxu0 %v3271_v56  ;;  %2334 = vmatprep.subr.bf16.mxu1 %v3276_v28  ;;  %v624_v56 = vmin.f32 %v623_v45, %v3809_v0  ;;  %v598_v28 = vmin.f32 %v597_v47, %v3820_v2  ;;  %v3322_v47 = vld [vmem:[#allocation2 + $0x580] ss:$16 sps:$4 sm:$0xff]  }
 0x381   :  { %2498 = vmatprep.subr.bf16.mxu0 %v3279_v62  ;;  %v661_v62 = vmin.f32 %v660_v50, %v3924_v22  ;;  %v3325_v50 = vld [vmem:[#allocation2 + $0x588] ss:$16 sps:$4 sm:$0xff]  }
 0x383   :  { %2335 = vmatpush1.bf16.msra.mxu1 %v3274_v12  ;;  %v3304_v12 = vld [vmem:[#allocation2 + $0x520] ss:$16 sps:$4 sm:$0xff]  }
 0x384   :  { %2499 = vmatpush1.bf16.msra.mxu0 %v3277_v15  ;;  %2336 = vmatprep.subr.bf16.mxu1 %v3282_v14  ;;  %v3307_v15 = vld [vmem:[#allocation2 + $0x528] ss:$16 sps:$4 sm:$0xff]   ;;  %v3312_v14 = vld [vmem:[#allocation2 + $0x544] ss:$16 sps:$4 sm:$0xff]  }
 0x385   :  { %2500 = vmatprep.subr.bf16.mxu0 %v3285_v17  ;;  %v625_v17 = vmin.f32 %v624_v56, %v3834_v21 }
 0x387   :  { %2337 = vmatpush1.bf16.msra.mxu1 %v3280_v60  ;;  %v635_v60 = vrot.slane %v634_v11, 4 }
 0x388   :  { %2501 = vmatpush1.bf16.msra.mxu0 %v3283_v13  ;;  %2338 = vmatprep.subr.bf16.mxu1 %v3288_v20  ;;  %v3315_v13 = vld [vmem:[#allocation2 + $0x54c] ss:$16 sps:$4 sm:$0xff]   ;;  %v599_v20 = vrot.slane %v598_v28, 4 }
 0x389   :  { %2502 = vmatprep.subr.bf16.mxu0 %v3291_v41  ;;  %v662_v41 = vrot.slane %v661_v62, 4 }
 0x38b   :  { %2339 = vmatpush1.bf16.msra.mxu1 %v3286_v10  ;;  %v3310_v10 = vld [vmem:[#allocation2 + $0x540] ss:$16 sps:$4 sm:$0xff]   ;;  %v663_v23 = vmin.f32 %v661_v62, %v662_v41 }
 0x38c   :  { %2503 = vmatpush1.bf16.msra.mxu0 %v3289_v5  ;;  %2340 = vmatprep.subr.bf16.mxu1 %v3294_v24  ;;  %v3313_v5 = vld [vmem:[#allocation2 + $0x548] ss:$16 sps:$4 sm:$0xff]   ;;  %v3318_v24 = vld [vmem:[#allocation2 + $0x564] ss:$16 sps:$4 sm:$0xff]  }
 0x38d   :  { %2504 = vmatprep.subr.bf16.mxu0 %v3297_v25  ;;  %v626_v25 = vrot.slane %v625_v17, 4  ;;  %v664_v45 = vrot.slane %v663_v23, 2 }
 0x38f   :  { %2341 = vmatpush1.bf16.msra.mxu1 %v3292_v26  ;;  %v636_v26 = vmin.f32 %v634_v11, %v635_v60  ;;  %v627_v38 = vmin.f32 %v625_v17, %v626_v25  ;;  %v3330_v11 = vld [vmem:[#allocation2 + $0x5a4] ss:$16 sps:$4 sm:$0xff]  }
 0x390   :  { %2505 = vmatpush1.bf16.msra.mxu0 %v3295_v3  ;;  %2342 = vmatprep.subr.bf16.mxu1 %v3300_v9  ;;  %v3321_v3 = vld [vmem:[#allocation2 + $0x56c] ss:$16 sps:$4 sm:$0xff]   ;;  %v600_v9 = vmin.f32 %v598_v28, %v599_v20  ;;  %v3336_v17 = vld [vmem:[#allocation2 + $0x5c4] ss:$16 sps:$4 sm:$0xff]  }
 0x391   :  { %2506 = vmatprep.subr.bf16.mxu0 %v3303_v27  ;;  %v3316_v27 = vld [vmem:[#allocation2 + $0x560] ss:$16 sps:$4 sm:$0xff]   ;;  %v3333_v28 = vld [vmem:[#allocation2 + $0x5ac] ss:$16 sps:$4 sm:$0xff]   ;;  %v3342_v25 = vld [vmem:[#allocation2 + $0x5e4] ss:$16 sps:$4 sm:$0xff]  }
 0x393   :  { %2343 = vmatpush1.bf16.msra.mxu1 %v3298_v43  ;;  %v637_v43 = vrot.slane %v636_v26, 2 }
 0x394   :  { %2507 = vmatpush1.bf16.msra.mxu0 %v3301_v29  ;;  %2344 = vmatprep.subr.bf16.mxu1 %v3306_v42  ;;  %v3327_v29 = vld [vmem:[#allocation2 + $0x58c] ss:$16 sps:$4 sm:$0xff]   ;;  %v601_v42 = vrot.slane %v600_v9, 2 }
 0x395   :  { %2508 = vmatprep.subr.bf16.mxu0 %v3309_v53  ;;  %v628_v53 = vrot.slane %v627_v38, 2  ;;  %v638_v56 = vmin.f32 %v636_v26, %v637_v43  ;;  %v3345_v26 = vld [vmem:[#allocation2 + $0x5ec] ss:$16 sps:$4 sm:$0xff]  }
 0x396   :  { %v602_v62 = vmin.f32 %v600_v9, %v601_v42 }
 0x397   :  { %2345 = vmatpush1.bf16.msra.mxu1 %v3304_v12  ;;  %v3328_v12 = vld [vmem:[#allocation2 + $0x5a0] ss:$16 sps:$4 sm:$0xff]   ;;  %v639_v60 = vrot.slane %v638_v56, 1  ;;  %v629_v20 = vmin.f32 %v627_v38, %v628_v53  ;;  %v3348_v38 = vld [vmem:[#allocation2 + $0x604] ss:$16 sps:$4 sm:$0xff]  }
 0x398   :  { %2509 = vmatpush1.bf16.msra.mxu0 %v3307_v15  ;;  %2346 = vmatprep.subr.bf16.mxu1 %v3312_v14  ;;  %v665_v15 = vmin.f32 %v663_v23, %v664_v45  ;;  %v3331_v14 = vld [vmem:[#allocation2 + $0x5a8] ss:$16 sps:$4 sm:$0xff]   ;;  %v603_v41 = vrot.slane %v602_v62, 1  ;;  %v3340_v23 = vld [vmem:[#allocation2 + $0x5e0] ss:$16 sps:$4 sm:$0xff]  }
 0x399   :  { %2510 = vmatprep.subr.bf16.mxu0 %v3315_v13  ;;  %v3339_v13 = vld [vmem:[#allocation2 + $0x5cc] ss:$16 sps:$4 sm:$0xff]   ;;  %v630_v9 = vrot.slane %v629_v20, 1  ;;  %v3346_v45 = vld [vmem:[#allocation2 + $0x600] ss:$16 sps:$4 sm:$0xff]  }
 0x39a   :  { %v3354_v53 = vld [vmem:[#allocation2 + $0x624] ss:$16 sps:$4 sm:$0xff]  }
 0x39b   :  { %2347 = vmatpush1.bf16.msra.mxu1 %v3310_v10  ;;  %v3334_v10 = vld [vmem:[#allocation2 + $0x5c0] ss:$16 sps:$4 sm:$0xff]   ;;  %v631_v42 = vmin.f32 %v629_v20, %v630_v9  ;;  %v3369_v20 = vld [vmem:[#allocation2 + $0x66c] ss:$16 sps:$4 sm:$0xff]  }
 0x39c   :  { %2511 = vmatpush1.bf16.msra.mxu0 %v3313_v5  ;;  %2348 = vmatprep.subr.bf16.mxu1 %v3318_v24  ;;  %v666_v5 = vrot.slane %v665_v15, 1  ;;  %v3337_v24 = vld [vmem:[#allocation2 + $0x5c8] ss:$16 sps:$4 sm:$0xff]   ;;  %v3381_v9 = vld [vmem:[#allocation2 + $0x6ac] ss:$16 sps:$4 sm:$0xff]  }
 0x39d   :  { %2512 = vmatprep.subr.bf16.mxu0 %v3321_v3  ;;  %v640_v3 = vmin.f32 %v638_v56, %v639_v60  ;;  %v3361_v60 = vld [vmem:[#allocation2 + $0x648] ss:$16 sps:$4 sm:$0xff]  }
 0x39f   :  { %2349 = vmatpush1.bf16.msra.mxu1 %v3316_v27  ;;  %v604_v27 = vmin.f32 %v602_v62, %v603_v41  ;;  %v3352_v62 = vld [vmem:[#allocation2 + $0x620] ss:$16 sps:$4 sm:$0xff]  }
 0x3a0   :  { %2513 = vmatpush1.bf16.msra.mxu0 %v3319_v31  ;;  %2350 = vmatprep.subr.bf16.mxu1 %v3324_v33  ;;  %v667_v31 = vmin.f32 %v665_v15, %v666_v5  ;;  %v3343_v33 = vld [vmem:[#allocation2 + $0x5e8] ss:$16 sps:$4 sm:$0xff]   ;;  %v3360_v15 = vld [vmem:[#allocation2 + $0x644] ss:$16 sps:$4 sm:$0xff]   ;;  %v3364_v41 = vld [vmem:[#allocation2 + $0x660] ss:$16 sps:$4 sm:$0xff]  }
 0x3a1   :  { %2514 = vmatprep.subr.bf16.mxu0 %v3327_v29  ;;  %v692_v43 = vsel %vm211_vm4, %v640_v3, %v604_v27  ;;  %v3351_v29 = vld [vmem:[#allocation2 + $0x60c] ss:$16 sps:$4 sm:$0xff]   ;;  %v3372_v5 = vld [vmem:[#allocation2 + $0x684] ss:$16 sps:$4 sm:$0xff]   ;;  %v3379_v27 = vld [vmem:[#allocation2 + $0x6a8] ss:$16 sps:$4 sm:$0xff]  }
 0x3a2   :  { %v3378_v3 = vld [vmem:[#allocation2 + $0x6a4] ss:$16 sps:$4 sm:$0xff]  }
 0x3a3   :  { %2351 = vmatpush1.bf16.msra.mxu1 %v3322_v47  ;;  %v695_v47 = vsel %vm211_vm4, %v667_v31, %v631_v42  ;;  %v3384_v31 = vld [vmem:[#allocation2 + $0x6c4] ss:$16 sps:$4 sm:$0xff]   ;;  %v3393_v42 = vld [vmem:[#allocation2 + $0x6ec] ss:$16 sps:$4 sm:$0xff]  }
 0x3a4   :  { %2515 = vmatpush1.bf16.msra.mxu0 %v3325_v50  ;;  %2352 = vmatprep.subr.bf16.mxu1 %v3330_v11  ;;  %v704_v50 = vpack.c.bf16 %v692_v43, %v692_v43  ;;  %v3349_v11 = vld [vmem:[#allocation2 + $0x608] ss:$16 sps:$4 sm:$0xff]   ;;  %v707_v56 = vpack.c.bf16 %v695_v47, %v695_v47 }
 0x3a5   :  { %2516 = vmatprep.subr.bf16.mxu0 %v3333_v28  ;;  %v3357_v28 = vld [vmem:[#allocation2 + $0x62c] ss:$16 sps:$4 sm:$0xff]   ;;  %v3385_v43 = vld [vmem:[#allocation2 + $0x6c8] ss:$16 sps:$4 sm:$0xff]  }
 0x3a6   :  { %v3391_v47 = vld [vmem:[#allocation2 + $0x6e8] ss:$16 sps:$4 sm:$0xff]  }
 0x3a7   :  { %2353 = vmatpush1.bf16.msra.mxu1 %v3328_v12  ;;  %v3355_v12 = vld [vmem:[#allocation2 + $0x628] ss:$16 sps:$4 sm:$0xff]  }
 0x3a8   :  { %2517 = vmatpush1.bf16.msra.mxu0 %v3331_v14  ;;  %2354 = vmatprep.subr.bf16.mxu1 %v3336_v17  ;;  %v3363_v14 = vld [vmem:[#allocation2 + $0x64c] ss:$16 sps:$4 sm:$0xff]   ;;  %v3358_v17 = vld [vmem:[#allocation2 + $0x640] ss:$16 sps:$4 sm:$0xff]  }
 0x3a9   :  { %2518 = vmatprep.subr.bf16.mxu0 %v3339_v13  ;;  %v3366_v13 = vld [vmem:[#allocation2 + $0x664] ss:$16 sps:$4 sm:$0xff]  }
 0x3ab   :  { %2355 = vmatpush1.bf16.msra.mxu1 %v3334_v10  ;;  %v3367_v10 = vld [vmem:[#allocation2 + $0x668] ss:$16 sps:$4 sm:$0xff]  }
 0x3ac   :  { %2519 = vmatpush1.bf16.msra.mxu0 %v3337_v24  ;;  %2356 = vmatprep.subr.bf16.mxu1 %v3342_v25  ;;  %v3375_v24 = vld [vmem:[#allocation2 + $0x68c] ss:$16 sps:$4 sm:$0xff]   ;;  %v3370_v25 = vld [vmem:[#allocation2 + $0x680] ss:$16 sps:$4 sm:$0xff]  }
 0x3ad   :  { %2520 = vmatprep.subr.bf16.mxu0 %v3345_v26  ;;  %v3373_v26 = vld [vmem:[#allocation2 + $0x688] ss:$16 sps:$4 sm:$0xff]  }
 0x3af   :  { %2357 = vmatpush1.bf16.msra.mxu1 %v3340_v23  ;;  %v3376_v23 = vld [vmem:[#allocation2 + $0x6a0] ss:$16 sps:$4 sm:$0xff]  }
 0x3b0   :  { %2521 = vmatpush1.bf16.msra.mxu0 %v3343_v33  ;;  %2367 = vmatprep.subr.bf16.mxu1 %v3348_v38  ;;  %v3387_v33 = vld [vmem:[#allocation2 + $0x6cc] ss:$16 sps:$4 sm:$0xff]   ;;  %v3382_v38 = vld [vmem:[#allocation2 + $0x6c0] ss:$16 sps:$4 sm:$0xff]  }
 0x3b1   :  { %2531 = vmatprep.subr.bf16.mxu0 %v3351_v29  ;;  %v3390_v29 = vld [vmem:[#allocation2 + $0x6e4] ss:$16 sps:$4 sm:$0xff]  }
 0x3b2   :  { %2359 = vmatmul.mubr.bf16.vlgmr.msra.gmra.mrb[4].mxu1 %v704_v50 }
 0x3b3   :  { %2523 = vmatmul.mubr.bf16.vlgmr.msra.gmra.mrb[4].mxu0 %v704_v50  ;;  %2368 = vmatpush1.bf16.msra.mxu1 %v3346_v45  ;;  %v3388_v45 = vld [vmem:[#allocation2 + $0x6e0] ss:$16 sps:$4 sm:$0xff]   ;;  %v3396_v50 = vld [vmem:[#allocation2 + $0x704] ss:$16 sps:$4 sm:$0xff]  }
 0x3b4   :  { %2399 = vmatprep.mubr.bf16.mxu1 %v707_v56  ;;  %2532 = vmatpush1.bf16.msra.mxu0 %v3349_v11  ;;  %v650_v11 = vmin.f32 %v3954_v1, %v3936_v36 }
 0x3b5   :  { %2563 = vmatprep.mubr.bf16.mxu0 %v707_v56  ;;  %2369 = vmatprep.subr.bf16.mxu1 %v3354_v53  ;;  %v3399_v53 = vld [vmem:[#allocation2 + $0x70c] ss:$16 sps:$4 sm:$0xff]   ;;  %v614_v56 = vmin.f32 %v3948_v49, %v3942_v40 }
 0x3b6   :  { %2533 = vmatprep.subr.bf16.mxu0 %v3357_v28  ;;  %v651_v28 = vmin.f32 %v650_v11, %v3960_v51  ;;  %v3426_v11 = vld [vmem:[#allocation2 + $0x7a4] ss:$16 sps:$4 sm:$0xff]  }
 0x3b7   :  { %2370 = vmatpush1.bf16.msra.mxu1 %v3352_v62  ;;  %v3394_v62 = vld [vmem:[#allocation2 + $0x700] ss:$16 sps:$4 sm:$0xff]  }
 0x3b8   :  { %2534 = vmatpush1.bf16.msra.mxu0 %v3355_v12  ;;  %2371 = vmatprep.subr.bf16.mxu1 %v3360_v15  ;;  %v3397_v12 = vld [vmem:[#allocation2 + $0x708] ss:$16 sps:$4 sm:$0xff]   ;;  %v3402_v15 = vld [vmem:[#allocation2 + $0x724] ss:$16 sps:$4 sm:$0xff]  }
 0x3b9   :  { %2535 = vmatprep.subr.bf16.mxu0 %v3363_v14  ;;  %v615_v14 = vmin.f32 %v614_v56, %v3966_v6  ;;  %v3429_v56 = vld [vmem:[#allocation2 + $0x7ac] ss:$16 sps:$4 sm:$0xff]  }
 0x3bb   :  { %2372 = vmatpush1.bf16.msra.mxu1 %v3358_v17  ;;  %v652_v17 = vmin.f32 %v651_v28, %v3974_v58 }
 0x3bc   :  { %2536 = vmatpush1.bf16.msra.mxu0 %v3361_v60  ;;  %2373 = vmatprep.subr.bf16.mxu1 %v3366_v13  ;;  %v3405_v60 = vld [vmem:[#allocation2 + $0x72c] ss:$16 sps:$4 sm:$0xff]   ;;  %v616_v13 = vmin.f32 %v615_v14, %v3982_v52 }
 0x3bd   :  { %2537 = vmatprep.subr.bf16.mxu0 %v3369_v20  ;;  %v3400_v20 = vld [vmem:[#allocation2 + $0x720] ss:$16 sps:$4 sm:$0xff]  }
 0x3bf   :  { %2374 = vmatpush1.bf16.msra.mxu1 %v3364_v41  ;;  %v3403_v41 = vld [vmem:[#allocation2 + $0x728] ss:$16 sps:$4 sm:$0xff]  }
 0x3c0   :  { %2538 = vmatpush1.bf16.msra.mxu0 %v3367_v10  ;;  %2375 = vmatprep.subr.bf16.mxu1 %v3372_v5  ;;  %v3408_v10 = vld [vmem:[#allocation2 + $0x744] ss:$16 sps:$4 sm:$0xff]   ;;  %v653_v5 = vrot.slane %v652_v17, 4 }
 0x3c1   :  { %2539 = vmatprep.subr.bf16.mxu0 %v3375_v24  ;;  %v3411_v24 = vld [vmem:[#allocation2 + $0x74c] ss:$16 sps:$4 sm:$0xff]  }
 0x3c3   :  { %2376 = vmatpush1.bf16.msra.mxu1 %v3370_v25  ;;  %v617_v25 = vrot.slane %v616_v13, 4 }
 0x3c4   :  { %2540 = vmatpush1.bf16.msra.mxu0 %v3373_v26  ;;  %2377 = vmatprep.subr.bf16.mxu1 %v3378_v3  ;;  %v3406_v26 = vld [vmem:[#allocation2 + $0x740] ss:$16 sps:$4 sm:$0xff]   ;;  %v3409_v3 = vld [vmem:[#allocation2 + $0x748] ss:$16 sps:$4 sm:$0xff]  }
 0x3c5   :  { %2541 = vmatprep.subr.bf16.mxu0 %v3381_v9  ;;  %v3414_v9 = vld [vmem:[#allocation2 + $0x764] ss:$16 sps:$4 sm:$0xff]  }
 0x3c7   :  { %2378 = vmatpush1.bf16.msra.mxu1 %v3376_v23  ;;  %v654_v23 = vmin.f32 %v652_v17, %v653_v5  ;;  %v3435_v17 = vld [vmem:[#allocation2 + $0x7cc] ss:$16 sps:$4 sm:$0xff]  }
 0x3c8   :  { %2542 = vmatpush1.bf16.msra.mxu0 %v3379_v27  ;;  %2379 = vmatprep.subr.bf16.mxu1 %v3384_v31  ;;  %v3417_v27 = vld [vmem:[#allocation2 + $0x76c] ss:$16 sps:$4 sm:$0xff]   ;;  %v618_v31 = vmin.f32 %v616_v13, %v617_v25  ;;  %v3430_v13 = vld [vmem:[#allocation2 + $0x7c0] ss:$16 sps:$4 sm:$0xff]  }
 0x3c9   :  { %2543 = vmatprep.subr.bf16.mxu0 %v3387_v33  ;;  %v3412_v33 = vld [vmem:[#allocation2 + $0x760] ss:$16 sps:$4 sm:$0xff]  }
 0x3cb   :  { %2380 = vmatpush1.bf16.msra.mxu1 %v3382_v38  ;;  %v3415_v38 = vld [vmem:[#allocation2 + $0x768] ss:$16 sps:$4 sm:$0xff]  }
 0x3cc   :  { %2544 = vmatpush1.bf16.msra.mxu0 %v3385_v43  ;;  %2381 = vmatprep.subr.bf16.mxu1 %v3390_v29  ;;  %v3420_v43 = vld [vmem:[#allocation2 + $0x784] ss:$16 sps:$4 sm:$0xff]   ;;  %v655_v29 = vrot.slane %v654_v23, 2 }
 0x3cd   :  { %2545 = vmatprep.subr.bf16.mxu0 %v3393_v42  ;;  %v3423_v42 = vld [vmem:[#allocation2 + $0x78c] ss:$16 sps:$4 sm:$0xff]  }
 0x3cf   :  { %2382 = vmatpush1.bf16.msra.mxu1 %v3388_v45  ;;  %v619_v45 = vrot.slane %v618_v31, 2 }
 0x3d0   :  { %2546 = vmatpush1.bf16.msra.mxu0 %v3391_v47  ;;  %2383 = vmatprep.subr.bf16.mxu1 %v3396_v50  ;;  %v3418_v47 = vld [vmem:[#allocation2 + $0x780] ss:$16 sps:$4 sm:$0xff]   ;;  %v3421_v50 = vld [vmem:[#allocation2 + $0x788] ss:$16 sps:$4 sm:$0xff]  }
 0x3d1   :  { %2547 = vmatprep.subr.bf16.mxu0 %v3399_v53  ;;  %v656_v53 = vmin.f32 %v654_v23, %v655_v29  ;;  %v620_v28 = vmin.f32 %v618_v31, %v619_v45 }
 0x3d3   :  { %2384 = vmatpush1.bf16.msra.mxu1 %v3394_v62  ;;  %v3424_v62 = vld [vmem:[#allocation2 + $0x7a0] ss:$16 sps:$4 sm:$0xff]   ;;  %v657_v14 = vrot.slane %v656_v53, 1 }
 0x3d4   :  { %2548 = vmatpush1.bf16.msra.mxu0 %v3397_v12  ;;  %2385 = vmatprep.subr.bf16.mxu1 %v3402_v15  ;;  %v3427_v12 = vld [vmem:[#allocation2 + $0x7a8] ss:$16 sps:$4 sm:$0xff]   ;;  %v3432_v15 = vld [vmem:[#allocation2 + $0x7c4] ss:$16 sps:$4 sm:$0xff]  }
 0x3d5   :  { %2549 = vmatprep.subr.bf16.mxu0 %v3405_v60  ;;  %v621_v60 = vrot.slane %v620_v28, 1  ;;  %v658_v5 = vmin.f32 %v656_v53, %v657_v14 }
 0x3d7   :  { %2386 = vmatpush1.bf16.msra.mxu1 %v3400_v20  ;;  %v3433_v20 = vld [vmem:[#allocation2 + $0x7c8] ss:$16 sps:$4 sm:$0xff]   ;;  %v622_v25 = vmin.f32 %v620_v28, %v621_v60 }
 0x3d8   :  { %2550 = vmatpush1.bf16.msra.mxu0 %v3403_v41  ;;  %2387 = vmatprep.subr.bf16.mxu1 %v3408_v10  ;;  %v3438_v41 = vld [vmem:[#allocation2 + $0x7e4] ss:$16 sps:$4 sm:$0xff]   ;;  %v3441_v10 = vld [vmem:[#allocation2 + $0x7ec] ss:$16 sps:$4 sm:$0xff]  }
 0x3d9   :  { %2551 = vmatprep.subr.bf16.mxu0 %v3411_v24  ;;  %v3436_v24 = vld [vmem:[#allocation2 + $0x7e0] ss:$16 sps:$4 sm:$0xff]  }
 0x3db   :  { %2388 = vmatpush1.bf16.msra.mxu1 %v3406_v26  ;;  %v3439_v26 = vld [vmem:[#allocation2 + $0x7e8] ss:$16 sps:$4 sm:$0xff]  }
 0x3dc   :  { %2552 = vmatpush1.bf16.msra.mxu0 %v3409_v3  ;;  %2389 = vmatprep.subr.bf16.mxu1 %v3414_v9  ;;  %v694_v3 = vsel %vm211_vm4, %v658_v5, %v622_v25 }
 0x3dd   :  { %2553 = vmatprep.subr.bf16.mxu0 %v3417_v27  ;;  %v706_v9 = vpack.c.bf16 %v694_v3, %v694_v3 }
 0x3df   :  { %2390 = vmatpush1.bf16.msra.mxu1 %v3412_v33 }
 0x3e0   :  { %2554 = vmatpush1.bf16.msra.mxu0 %v3415_v38  ;;  %2391 = vmatprep.subr.bf16.mxu1 %v3420_v43 }
 0x3e1   :  { %2555 = vmatprep.subr.bf16.mxu0 %v3423_v42 }
 0x3e3   :  { %2392 = vmatpush1.bf16.msra.mxu1 %v3418_v47 }
 0x3e4   :  { %2556 = vmatpush1.bf16.msra.mxu0 %v3421_v50  ;;  %2393 = vmatprep.subr.bf16.mxu1 %v3426_v11 }
 0x3e5   :  { %2557 = vmatprep.subr.bf16.mxu0 %v3429_v56 }
 0x3e7   :  { %2394 = vmatpush1.bf16.msra.mxu1 %v3424_v62 }
 0x3e8   :  { %2558 = vmatpush1.bf16.msra.mxu0 %v3427_v12  ;;  %2395 = vmatprep.subr.bf16.mxu1 %v3432_v15 }
 0x3e9   :  { %2559 = vmatprep.subr.bf16.mxu0 %v3435_v17 }
 0x3eb   :  { %2396 = vmatpush1.bf16.msra.mxu1 %v3430_v13 }
 0x3ec   :  { %2560 = vmatpush1.bf16.msra.mxu0 %v3433_v20  ;;  %2397 = vmatprep.subr.bf16.mxu1 %v3438_v41 }
 0x3ed   :  { %2561 = vmatprep.subr.bf16.mxu0 %v3441_v10  ;;  %v3524_v10 = vmov 1966171168  }
 0x3ee   :  { %v2599_v5 = vunpack.c.l.s4 %v3524_v10 }
 0x3ef   :  { %2398 = vmatpush1.bf16.msra.mxu1 %v3436_v24 }
 0x3f0   :  { %2562 = vmatpush1.bf16.msra.mxu0 %v3439_v26  ;;  %v2600_v24 = vunpack.c.0.s8 %v2599_v5 }
 0x3f2   :  { %2400 = vmatmul.mubr.bf16.vlgmr.msra.gmra.mrb[4].mxu1 %v706_v9  ;;  %v2603_v3 = vsub.s32 %v2600_v24, %v3708_v34 }
 0x3f3   :  { %2564 = vmatmul.mubr.bf16.vlgmr.msra.gmra.mrb[4].mxu0 %v706_v9 }
 0x4c5   :  { %v2401_v23 = vpop.f32.mrb[4].mxu1 }
 0x4c6   :  { %v2572_v27 = vsub.f32 0.0, %v2401_v23  ;;  %v2565_v31 = vpop.f32.mrb[4].mxu0  ;;  %v2403_v33 = vpop.f32.mrb[5].mxu1 }
 0x4c7   :  { %v2574_v38 = vsub.f32 0.0, %v2565_v31  ;;  %v2573_v43 = vsub.f32 0.0, %v2403_v33  ;;  %v2567_v29 = vpop.f32.mrb[5].mxu0  ;;  %v2405_v42 = vpop.f32.mrb[6].mxu1 }
 0x4c8   :  { %v2576_v45 = vmul.f32 1.442695, %v2572_v27  ;;  %v2575_v47 = vsub.f32 0.0, %v2567_v29  ;;  %v2569_v50 = vpop.f32.mrb[6].mxu0  ;;  %v2406_v11 = vpop.f32.mrb[7].mxu1  ;;  %v2638_v42 = vsub.s32 2, %v3708_v34 }
 0x4c9   :  { %v2580_v53 = vmul.f32 1.442695, %v2574_v38  ;;  %v2578_v56 = vmul.f32 1.442695, %v2573_v43  ;;  %v2570_v28 = vpop.f32.mrb[7].mxu0  ;;  %v4173_v11 = vld [vmem:[#allocation5_spill] sm:$0xff] }
 0x4ca   :  { %3446 = vpow2.f32 %v2576_v45  ;;  %v2582_v62 = vmul.f32 1.442695, %v2575_v47  ;;  %v2642_v45 = vsub.s32 3, %v3708_v34 }
 0x4cb   :  { %3448 = vpow2.f32 %v2580_v53 }
 0x4cc   :  { %3450 = vpow2.f32 %v2578_v56  ;;  %v4174_v56 = vld [vmem:[#allocation6_spill] sm:$0xff] }
 0x4cd   :  { %3452 = vpow2.f32 %v2582_v62 }
 0x4d4   :  { %v3447_v12 = vpop.eup %3446 }
 0x4d5   :  { %v3449_v15 = vpop.eup %3448  ;;  %v2584_v14 = vadd.f32 1.0, %v3447_v12 }
 0x4d6   :  { %v3451_v17 = vpop.eup %3450  ;;  %v2586_v60 = vadd.f32 1.0, %v3449_v15 }
 0x4d7   :  { %v3453_v13 = vpop.eup %3452  ;;  %3454 = vrcp.f32 %v2584_v14  ;;  %v2585_v20 = vadd.f32 1.0, %v3451_v17 }
 0x4d8   :  { %3456 = vrcp.f32 %v2586_v60  ;;  %v2587_v41 = vadd.f32 1.0, %v3453_v13 }
 0x4d9   :  { %3458 = vrcp.f32 %v2585_v20 }
 0x4da   :  { %3460 = vrcp.f32 %v2587_v41 }
 0x4e1   :  { %v3455_v25 = vpop.eup %3454 }
 0x4e2   :  { %v3457_v26 = vpop.eup %3456 }
 0x4e3   :  { %v3459_v9 = vpop.eup %3458 }
 0x4e4   :  { %v3461_v23 = vpop.eup %3460  ;;  %v2596_v27 = vcombine.low %v3455_v25, %v3459_v9 }
 0x4e5   :  { %v2597_v31 = vcombine.low %v3457_v26, %v3461_v23 }
 0x4e6   :  { %v2604_v33 = vrot.slane %v2596_v27, %v2603_v3 }
 0x4e7   :  { %v2611_v38 = vrot.slane %v2597_v31, %v2603_v3 }
 0x4e9   :  { %v2612_v43 = vcombine.low %v2604_v33, %v2611_v38  ;;  %v2613_v29 = vcombine.high %v2604_v33, %v2611_v38 }
 0x4eb   :  { %v2620_v47 = vrot.slane %v2612_v43, %v2603_v3  ;;  %v2627_v50 = vrot.slane %v2613_v29, %v2603_v3 }
 0x4ed   :  { %v2631_v53 = vrot.slane %v2620_v47, %v4173_v11  ;;  %v2635_v28 = vrot.slane %v2620_v47, %v4174_v56  ;;  %v2639_v62 = vrot.slane %v2620_v47, %v2638_v42  ;;  %v2643_v12 = vrot.slane %v2620_v47, %v2642_v45 }
 0x4ee   :  { %v2647_v15 = vrot.slane %v2627_v50, %v4173_v11  ;;  %v2651_v14 = vrot.slane %v2627_v50, %v4174_v56  ;;  %v2655_v17 = vrot.slane %v2627_v50, %v2638_v42  ;;  %v2659_v60 = vrot.slane %v2627_v50, %v2642_v45 }
 0x4ef   :  { %v2668_v13 = vmul.f32 %v2631_v53, %v3763_v57  ;;  %v2669_v20 = vmul.f32 %v2635_v28, %v3775_v61  ;;  %v2670_v34 = vmul.f32 %v2639_v62, %v3948_v49  ;;  %v2671_v41 = vmul.f32 %v2643_v12, %v3793_v4 }
 0x4f0   :  { %v2672_v10 = vmul.f32 %v2631_v53, %v3757_v55  ;;  %v2673_v5 = vmul.f32 %v2635_v28, %v3769_v59  ;;  %v2674_v24 = vmul.f32 %v2639_v62, %v3942_v40  ;;  %v2675_v25 = vmul.f32 %v2643_v12, %v3787_v8 }
 0x4f1   :  { %v2676_v26 = vmul.f32 %v2631_v53, %v3781_v63  ;;  %v2677_v3 = vmul.f32 %v2635_v28, %v3803_v7  ;;  %v2678_v57 = vmul.f32 %v2639_v62, %v3966_v6  ;;  %v2679_v61 = vmul.f32 %v2643_v12, %v3809_v0  ;;  %2700 = vst [vmem:[%s4166_s6] sm:$0xff] %v2668_v13 }
 0x4f2   :  { %2701 = vst [vmem:[%s4166_s6 + $0x8] sm:$0xff] %v2669_v20  ;;  %2702 = vst [vmem:[%s4166_s6 + $0x10] sm:$0xff] %v2670_v34  ;;  %v2680_v55 = vmul.f32 %v2631_v53, %v3820_v2  ;;  %v2681_v59 = vmul.f32 %v2635_v28, %v3826_v18  ;;  %v2682_v63 = vmul.f32 %v2639_v62, %v3982_v52 }
 0x4f3   :  { %2703 = vst [vmem:[%s4166_s6 + $0x18] sm:$0xff] %v2671_v41  ;;  %v2683_v8 = vmul.f32 %v2643_v12, %v3834_v21  ;;  %2704 = vst [vmem:[%s4166_s6 + $0x20] sm:$0xff] %v2672_v10  ;;  %v2684_v4 = vmul.f32 %v2647_v15, %v3859_v35  ;;  %v2685_v7 = vmul.f32 %v2651_v14, %v3865_v37 }
 0x4f4   :  { %2705 = vst [vmem:[%s4166_s6 + $0x28] sm:$0xff] %v2673_v5  ;;  %2706 = vst [vmem:[%s4166_s6 + $0x30] sm:$0xff] %v2674_v24  ;;  %v2686_v0 = vmul.f32 %v2655_v17, %v3954_v1  ;;  %v2687_v2 = vmul.f32 %v2659_v60, %v3889_v48  ;;  %v2688_v18 = vmul.f32 %v2647_v15, %v3847_v30 }
 0x4f5   :  { %2707 = vst [vmem:[%s4166_s6 + $0x38] sm:$0xff] %v2675_v25  ;;  %2708 = vst [vmem:[%s4166_s6 + $0x40] sm:$0xff] %v2676_v26  ;;  %v2689_v21 = vmul.f32 %v2651_v14, %v3853_v32  ;;  %v2690_v35 = vmul.f32 %v2655_v17, %v3936_v36  ;;  %v2691_v37 = vmul.f32 %v2659_v60, %v3871_v39 }
 0x4f6   :  { %2709 = vst [vmem:[%s4166_s6 + $0x48] sm:$0xff] %v2677_v3  ;;  %2710 = vst [vmem:[%s4166_s6 + $0x50] sm:$0xff] %v2678_v57  ;;  %v2692_v30 = vmul.f32 %v2647_v15, %v3877_v44  ;;  %v2693_v32 = vmul.f32 %v2651_v14, %v3883_v46  ;;  %v2694_v39 = vmul.f32 %v2655_v17, %v3960_v51 }
 0x4f7   :  { %2711 = vst [vmem:[%s4166_s6 + $0x58] sm:$0xff] %v2679_v61  ;;  %2712 = vst [vmem:[%s4166_s6 + $0x60] sm:$0xff] %v2680_v55  ;;  %v2695_v48 = vmul.f32 %v2659_v60, %v3895_v54  ;;  %v2696_v44 = vmul.f32 %v2647_v15, %v3912_v16  ;;  %v2697_v46 = vmul.f32 %v2651_v14, %v3918_v19 }
 0x4f8   :  { %2713 = vst [vmem:[%s4166_s6 + $0x68] sm:$0xff] %v2681_v59  ;;  %2714 = vst [vmem:[%s4166_s6 + $0x70] sm:$0xff] %v2682_v63  ;;  %v2698_v54 = vmul.f32 %v2655_v17, %v3974_v58  ;;  %v2699_v36 = vmul.f32 %v2659_v60, %v3924_v22 }
 0x4f9   :  { %2715 = vst [vmem:[%s4166_s6 + $0x78] sm:$0xff] %v2683_v8  ;;  %2716 = vst [vmem:[%s4166_s6 + $0x80] sm:$0xff] %v2684_v4 }
 0x4fa   :  { %2717 = vst [vmem:[%s4166_s6 + $0x88] sm:$0xff] %v2685_v7  ;;  %2718 = vst [vmem:[%s4166_s6 + $0x90] sm:$0xff] %v2686_v0 }
 0x4fb   :  { %2719 = vst [vmem:[%s4166_s6 + $0x98] sm:$0xff] %v2687_v2  ;;  %2720 = vst [vmem:[%s4166_s6 + $0xa0] sm:$0xff] %v2688_v18 }
 0x4fc   :  { %2721 = vst [vmem:[%s4166_s6 + $0xa8] sm:$0xff] %v2689_v21  ;;  %2722 = vst [vmem:[%s4166_s6 + $0xb0] sm:$0xff] %v2690_v35 }
 0x4fd   :  { %2723 = vst [vmem:[%s4166_s6 + $0xb8] sm:$0xff] %v2691_v37  ;;  %2724 = vst [vmem:[%s4166_s6 + $0xc0] sm:$0xff] %v2692_v30 }
 0x4fe   :  { %2725 = vst [vmem:[%s4166_s6 + $0xc8] sm:$0xff] %v2693_v32  ;;  %2726 = vst [vmem:[%s4166_s6 + $0xd0] sm:$0xff] %v2694_v39 }
 0x4ff   :  { %2727 = vst [vmem:[%s4166_s6 + $0xd8] sm:$0xff] %v2695_v48  ;;  %2728 = vst [vmem:[%s4166_s6 + $0xe0] sm:$0xff] %v2696_v44 }
 0x500   :  { %2729 = vst [vmem:[%s4166_s6 + $0xe8] sm:$0xff] %v2697_v46  ;;  %2730 = vst [vmem:[%s4166_s6 + $0xf0] sm:$0xff] %v2698_v54 }
 0x501   :  { %2731 = vst [vmem:[%s4166_s6 + $0xf8] sm:$0xff] %v2699_v36 }
 0x502   :  { %2736 = vsyncpa [#allocation3], 1 }

</bundles_post_ra>
